<compile_context>
chip_gen: v5e
topology: v5e:2x2
jax: 0.10.0
libtpu: 0.0.40
codegen_flags: <defaults>
</compile_context>

<pallas_src>
import jax
import jax.numpy as jnp
from jax import lax
from jax.experimental import pallas as pl
from jax.experimental.pallas import tpu as pltpu

BN_EPS = 1e-5
_VMEM_LIMIT_BYTES = 32 * 1024 * 1024   # explicit scoped-VMEM limit; safe on v5e..v7x


def _round_up(v, m):
    return ((v + m - 1) // m) * m


def conv_block_forward(x_nchw, w_oihw, b, gamma, beta):
    N, Cin, H, W = x_nchw.shape
    Cout, _, KH, KW = w_oihw.shape
    Ho, Wo = H - KH + 1, W - KW + 1
    # Even conv-output extents (PyTorch MaxPool2d(2,2) drops nothing) and even H/W so the
    # 2x2 space-to-depth decomposition below covers every conv output exactly once -> the
    # in-kernel BN batch statistics match PyTorch training-mode BatchNorm2d exactly.
    assert Ho % 2 == 0 and Wo % 2 == 0 and H % 2 == 0 and W % 2 == 0
    Hp, Wp = Ho // 2, Wo // 2            # pooled output extents
    Hq, Wq = H // 2, W // 2              # parity-plane extents
    KK = KH * KW

    # Lane-dense extents (multiples of 128): Lq = flattened pooled grid (hp*Wq + wp),
    # Lx = flattened, shift-padded parity-plane length.
    Lq = _round_up(Hp * Wq, 128)
    Lx = _round_up(Lq + (KH // 2) * Wq + (KW // 2) + 1, 128)

    # ---- glue: 1x space-to-depth of the raw input (bf16), flattened & zero-padded -------
    # xq[n, rh, rw, ci, hq*Wq + wq] = x[n, ci, 2*hq + rh, 2*wq + rw]
    xq = x_nchw.astype(jnp.bfloat16).reshape(N, Cin, Hq, 2, Wq, 2)
    xq = jnp.transpose(xq, (0, 3, 5, 1, 2, 4))                    # (N, 2, 2, Cin, Hq, Wq)
    xq = xq.reshape(N, 2, 2, Cin, Hq * Wq)
    xq = jnp.pad(xq, ((0, 0), (0, 0), (0, 0), (0, 0), (0, Lx - Hq * Wq)))

    # Conv weight, tap-major: w_t[kh*KW + kw, co, ci] = w[co, ci, kh, kw]
    w_t = jnp.transpose(w_oihw, (2, 3, 0, 1)).reshape(KK, Cout, Cin).astype(jnp.bfloat16)
    # NOTE: conv bias `b` is intentionally not added: training-mode BN subtracts the
    # per-channel batch mean, which cancels the bias exactly (output is identical).

    cparams = pltpu.CompilerParams(
        dimension_semantics=("parallel",),      # v7x megacore: images split across both TCs
        vmem_limit_bytes=_VMEM_LIMIT_BYTES)

    slots = ((0, 0), (0, 1), (1, 0), (1, 1))    # (dh, dw) position inside the 2x2 pool window

    # ---- pass 1: in-kernel im2col conv (36 small accumulated MXU matmuls) + BN partials --
    def conv_stats_kernel(xq_ref, w_ref, conv_ref, stat_ref):
        # xq_ref  : (1, 2, 2, Cin, Lx) bf16 input parity planes (row-flattened, zero padded)
        # w_ref   : (KK, Cout, Cin)    bf16 conv weight, tap-major
        # conv_ref: (1, 4, Cout, Lq)   bf16 conv output per pool slot (invalid columns zeroed)
        # stat_ref: (1, Cout, 2)       f32 per-image [sum, sum_sq] over valid conv outputs
        col = lax.broadcasted_iota(jnp.int32, (1, Lq), 1)
        vmask = ((col < Hp * Wq) & (col % Wq < Wp)).astype(jnp.float32)
        ssum = jnp.zeros((Cout, 1), jnp.float32)
        ssq = jnp.zeros((Cout, 1), jnp.float32)
        for j, (dh, dw) in enumerate(slots):
            acc = jnp.zeros((Cout, Lq), jnp.float32)
            for kh in range(KH):
                rh, sh = (dh + kh) % 2, (dh + kh) // 2
                for kw in range(KW):
                    rw, sw = (dw + kw) % 2, (dw + kw) // 2
                    # (Cin, Lq) unit-stride lane slice: column k maps to pooled pos hp*Wq+wp
                    xs = xq_ref[0, rh, rw, :, pl.ds(sh * Wq + sw, Lq)]
                    acc = acc + jnp.dot(w_ref[kh * KW + kw], xs,
                                        preferred_element_type=jnp.float32)
            acc = acc * vmask                     # zero wrap/pad columns -> clean stats & pass 2
            conv_ref[0, j] = acc.astype(conv_ref.dtype)
            ssum = ssum + jnp.sum(acc, axis=1, keepdims=True)
            ssq = ssq + jnp.sum(acc * acc, axis=1, keepdims=True)
        stat_ref[0, :, 0:1] = ssum
        stat_ref[0, :, 1:2] = ssq

    conv_slots, stats = pl.pallas_call(
        conv_stats_kernel,
        out_shape=(jax.ShapeDtypeStruct((N, 4, Cout, Lq), jnp.bfloat16),
                   jax.ShapeDtypeStruct((N, Cout, 2), jnp.float32)),
        grid=(N,),
        in_specs=[pl.BlockSpec((1, 2, 2, Cin, Lx), lambda n: (n, 0, 0, 0, 0)),
                  pl.BlockSpec((KK, Cout, Cin), lambda n: (0, 0, 0))],
        out_specs=(pl.BlockSpec((1, 4, Cout, Lq), lambda n: (n, 0, 0, 0)),
                   pl.BlockSpec((1, Cout, 2), lambda n: (n, 0, 0))),
        compiler_params=cparams,
    )(xq, w_t)

    # ---- tiny stat reduction + BN scale/shift fold (plain JAX, O(Cout)) ------------------
    count = jnp.float32(N * Ho * Wo)
    mean = jnp.sum(stats[:, :, 0], axis=0) / count
    var = jnp.maximum(jnp.sum(stats[:, :, 1], axis=0) / count - mean * mean, 0.0)
    scale = gamma.astype(jnp.float32) * lax.rsqrt(var + BN_EPS)
    shift = beta.astype(jnp.float32) - mean * scale
    scale2 = scale.reshape(Cout, 1)
    shift2 = shift.reshape(Cout, 1)

    # ---- pass 2: BN affine + ReLU + 2x2 max-pool as a lane-dense running max -------------
    def bn_relu_pool_kernel(c_ref, scale_ref, shift_ref, o_ref):
        # c_ref    : (1, 4, Cout, Lq) bf16 conv per pool slot
        # scale_ref: (Cout, 1) f32, shift_ref: (Cout, 1) f32
        # o_ref    : (1, Cout, Lq) f32 pooled output (flattened hp*Wq + wp)
        scale_b = jnp.broadcast_to(scale_ref[...], (Cout, Lq))   # hoisted: built once, reused 4x
        shift_b = jnp.broadcast_to(shift_ref[...], (Cout, Lq))
        m = jnp.maximum(c_ref[0, 0].astype(jnp.float32) * scale_b + shift_b, 0.0)
        for j in range(1, 4):
            m = jnp.maximum(m, jnp.maximum(
                c_ref[0, j].astype(jnp.float32) * scale_b + shift_b, 0.0))
        o_ref[0] = m

    pooled = pl.pallas_call(
        bn_relu_pool_kernel,
        out_shape=jax.ShapeDtypeStruct((N, Cout, Lq), jnp.float32),
        grid=(N,),
        in_specs=[pl.BlockSpec((1, 4, Cout, Lq), lambda n: (n, 0, 0, 0)),
                  pl.BlockSpec((Cout, 1), lambda n: (0, 0)),
                  pl.BlockSpec((Cout, 1), lambda n: (0, 0))],
        out_specs=pl.BlockSpec((1, Cout, Lq), lambda n: (n, 0, 0)),
        compiler_params=cparams,
    )(conv_slots, scale2, shift2)

    # drop lane padding / invalid width columns -> NCHW output (no transpose needed)
    out = pooled[:, :, :Hp * Wq].reshape(N, Cout, Hp, Wq)[:, :, :, :Wp]
    return out


def reference_forward(x, w, b, gamma, beta):
    conv = lax.conv_general_dilated(
        x, w, window_strides=(1, 1), padding="VALID",
        dimension_numbers=("NCHW", "OIHW", "NCHW")) + b.reshape(1, -1, 1, 1)
    mean = jnp.mean(conv, axis=(0, 2, 3), keepdims=True)
    var = jnp.var(conv, axis=(0, 2, 3), keepdims=True)
    y = (conv - mean) * lax.rsqrt(var + BN_EPS)
    y = y * gamma.reshape(1, -1, 1, 1) + beta.reshape(1, -1, 1, 1)
    y = jnp.maximum(y, 0.0)
    return lax.reduce_window(y, -jnp.inf, lax.max,
                             (1, 1, 2, 2), (1, 1, 2, 2), "VALID")


if __name__ == "__main__":
    key = jax.random.PRNGKey(0)
    kx, kw, kb = jax.random.split(key, 3)

    N, Cin, H, W = 2, 4, 16, 16
    Cout, KH, KW = 8, 3, 3

    x = jax.random.normal(kx, (N, Cin, H, W), dtype=jnp.float32)
    fan_in = Cin * KH * KW
    w = jax.random.uniform(kw, (Cout, Cin, KH, KW), jnp.float32,
                           -1.0 / jnp.sqrt(fan_in), 1.0 / jnp.sqrt(fan_in))
    b = jax.random.uniform(kb, (Cout,), jnp.float32,
                           -1.0 / jnp.sqrt(fan_in), 1.0 / jnp.sqrt(fan_in))
    gamma = jnp.ones((Cout,), jnp.float32)
    beta = jnp.zeros((Cout,), jnp.float32)

    out = jax.jit(conv_block_forward)(x, w, b, gamma, beta)
    out = jax.block_until_ready(out)

    ref = reference_forward(x, w, b, gamma, beta)
    assert out.shape == (N, Cout, (H - KH + 1) // 2, (W - KW + 1) // 2)
    # bf16 matmul operands + bf16 conv intermediate (f32 accumulation/stats) -> loosened tol.
    assert jnp.allclose(out, ref, rtol=3e-2, atol=3e-2), float(jnp.max(jnp.abs(out - ref)))

    print("KERNEL_OK")
</pallas_src>

<mosaic_0001>
module attributes {stable_mosaic.version = 11 : i64} {
  func.func @bn_relu_pool_kernel(%arg0: i32, %arg1: memref<1x4x8x128xbf16, #tpu.memory_space<vmem>>, %arg2: memref<8x1xf32, #tpu.memory_space<vmem>>, %arg3: memref<8x1xf32, #tpu.memory_space<vmem>>, %arg4: memref<1x8x128xf32, #tpu.memory_space<vmem>>) attributes {dimension_semantics = [#tpu.dimension_semantics<parallel>], iteration_bounds = array<i64: 2>, scalar_prefetch = 0 : i64, scratch_operands = 0 : i64, tpu.core_type = #tpu.core_type<tc>, window_params = [{transform_indices = @transform_0, window_bounds = array<i64: 1, 4, 8, 128>}, {pipeline_mode = #tpu.pipeline_mode<synchronous>, transform_indices = @transform_1, window_bounds = array<i64: 8, 1>}, {pipeline_mode = #tpu.pipeline_mode<synchronous>, transform_indices = @transform_2, window_bounds = array<i64: 8, 1>}, {transform_indices = @transform_3, window_bounds = array<i64: 1, 8, 128>}]} {
    %c0 = arith.constant 0 : index
    %c0_0 = arith.constant 0 : index
    %0 = vector.load %arg2[%c0, %c0_0] : memref<8x1xf32, #tpu.memory_space<vmem>>, vector<8x1xf32>
    %1 = vector.shape_cast %0 : vector<8x1xf32> to vector<8x1xf32>
    %2 = vector.broadcast %1 : vector<8x1xf32> to vector<8x128xf32>
    %c0_1 = arith.constant 0 : index
    %c0_2 = arith.constant 0 : index
    %3 = vector.load %arg3[%c0_1, %c0_2] : memref<8x1xf32, #tpu.memory_space<vmem>>, vector<8x1xf32>
    %4 = vector.shape_cast %3 : vector<8x1xf32> to vector<8x1xf32>
    %5 = vector.broadcast %4 : vector<8x1xf32> to vector<8x128xf32>
    %c0_3 = arith.constant 0 : index
    %c0_4 = arith.constant 0 : index
    %c0_5 = arith.constant 0 : index
    %c0_6 = arith.constant 0 : index
    %6 = vector.load %arg1[%c0_3, %c0_4, %c0_5, %c0_6] : memref<1x4x8x128xbf16, #tpu.memory_space<vmem>>, vector<1x1x8x128xbf16>
    %7 = vector.shape_cast %6 : vector<1x1x8x128xbf16> to vector<8x128xbf16>
    %8 = arith.extf %7 : vector<8x128xbf16> to vector<8x128xf32>
    %9 = arith.mulf %8, %2 : vector<8x128xf32>
    %10 = arith.addf %9, %5 : vector<8x128xf32>
    %cst = arith.constant 0.000000e+00 : f32
    %11 = vector.broadcast %cst : f32 to vector<8x128xf32>
    %12 = arith.maximumf %10, %11 : vector<8x128xf32>
    %c0_7 = arith.constant 0 : index
    %c1 = arith.constant 1 : index
    %c0_8 = arith.constant 0 : index
    %c0_9 = arith.constant 0 : index
    %13 = vector.load %arg1[%c0_7, %c1, %c0_8, %c0_9] : memref<1x4x8x128xbf16, #tpu.memory_space<vmem>>, vector<1x1x8x128xbf16>
    %14 = vector.shape_cast %13 : vector<1x1x8x128xbf16> to vector<8x128xbf16>
    %15 = arith.extf %14 : vector<8x128xbf16> to vector<8x128xf32>
    %16 = arith.mulf %15, %2 : vector<8x128xf32>
    %17 = arith.addf %16, %5 : vector<8x128xf32>
    %cst_10 = arith.constant 0.000000e+00 : f32
    %18 = vector.broadcast %cst_10 : f32 to vector<8x128xf32>
    %19 = arith.maximumf %17, %18 : vector<8x128xf32>
    %20 = arith.maximumf %12, %19 : vector<8x128xf32>
    %c0_11 = arith.constant 0 : index
    %c2 = arith.constant 2 : index
    %c0_12 = arith.constant 0 : index
    %c0_13 = arith.constant 0 : index
    %21 = vector.load %arg1[%c0_11, %c2, %c0_12, %c0_13] : memref<1x4x8x128xbf16, #tpu.memory_space<vmem>>, vector<1x1x8x128xbf16>
    %22 = vector.shape_cast %21 : vector<1x1x8x128xbf16> to vector<8x128xbf16>
    %23 = arith.extf %22 : vector<8x128xbf16> to vector<8x128xf32>
    %24 = arith.mulf %23, %2 : vector<8x128xf32>
    %25 = arith.addf %24, %5 : vector<8x128xf32>
    %cst_14 = arith.constant 0.000000e+00 : f32
    %26 = vector.broadcast %cst_14 : f32 to vector<8x128xf32>
    %27 = arith.maximumf %25, %26 : vector<8x128xf32>
    %28 = arith.maximumf %20, %27 : vector<8x128xf32>
    %c0_15 = arith.constant 0 : index
    %c3 = arith.constant 3 : index
    %c0_16 = arith.constant 0 : index
    %c0_17 = arith.constant 0 : index
    %29 = vector.load %arg1[%c0_15, %c3, %c0_16, %c0_17] : memref<1x4x8x128xbf16, #tpu.memory_space<vmem>>, vector<1x1x8x128xbf16>
    %30 = vector.shape_cast %29 : vector<1x1x8x128xbf16> to vector<8x128xbf16>
    %31 = arith.extf %30 : vector<8x128xbf16> to vector<8x128xf32>
    %32 = arith.mulf %31, %2 : vector<8x128xf32>
    %33 = arith.addf %32, %5 : vector<8x128xf32>
    %cst_18 = arith.constant 0.000000e+00 : f32
    %34 = vector.broadcast %cst_18 : f32 to vector<8x128xf32>
    %35 = arith.maximumf %33, %34 : vector<8x128xf32>
    %36 = arith.maximumf %28, %35 : vector<8x128xf32>
    %c0_19 = arith.constant 0 : index
    %c0_20 = arith.constant 0 : index
    %c0_21 = arith.constant 0 : index
    %37 = vector.load %arg4[%c0_19, %c0_20, %c0_21] : memref<1x8x128xf32, #tpu.memory_space<vmem>>, vector<1x8x128xf32>
    %38 = vector.shape_cast %37 : vector<1x8x128xf32> to vector<8x128xf32>
    %39 = vector.shape_cast %36 : vector<8x128xf32> to vector<1x8x128xf32>
    tpu.vector_store %arg4[%c0_19, %c0_20, %c0_21], %39 {strides = array<i32>} : memref<1x8x128xf32, #tpu.memory_space<vmem>>, vector<1x8x128xf32>,
    return
  }
  func.func @transform_0(%arg0: i32) -> (i32, i32, i32, i32) {
    %c0_i32 = arith.constant 0 : i32
    %c0_i32_0 = arith.constant 0 : i32
    %c0_i32_1 = arith.constant 0 : i32
    %c0_i32_2 = arith.constant 0 : i32
    return %arg0, %c0_i32, %c0_i32_0, %c0_i32_1 : i32, i32, i32, i32
  }
  func.func @transform_1(%arg0: i32) -> (i32, i32) {
    %c0_i32 = arith.constant 0 : i32
    %c0_i32_0 = arith.constant 0 : i32
    %c0_i32_1 = arith.constant 0 : i32
    return %c0_i32, %c0_i32_0 : i32, i32
  }
  func.func @transform_2(%arg0: i32) -> (i32, i32) {
    %c0_i32 = arith.constant 0 : i32
    %c0_i32_0 = arith.constant 0 : i32
    %c0_i32_1 = arith.constant 0 : i32
    return %c0_i32, %c0_i32_0 : i32, i32
  }
  func.func @transform_3(%arg0: i32) -> (i32, i32, i32) {
    %c0_i32 = arith.constant 0 : i32
    %c0_i32_0 = arith.constant 0 : i32
    %c0_i32_1 = arith.constant 0 : i32
    return %arg0, %c0_i32, %c0_i32_0 : i32, i32, i32
  }
}

module attributes {stable_mosaic.version = 11 : i64} {
  func.func @conv_stats_kernel(%arg0: i32, %arg1: memref<1x2x2x4x256xbf16, #tpu.memory_space<vmem>>, %arg2: memref<9x8x4xbf16, #tpu.memory_space<vmem>>, %arg3: memref<1x4x8x128xbf16, #tpu.memory_space<vmem>>, %arg4: memref<1x8x2xf32, #tpu.memory_space<vmem>>) attributes {dimension_semantics = [#tpu.dimension_semantics<parallel>], iteration_bounds = array<i64: 2>, scalar_prefetch = 0 : i64, scratch_operands = 0 : i64, tpu.core_type = #tpu.core_type<tc>, window_params = [{transform_indices = @transform_0, window_bounds = array<i64: 1, 2, 2, 4, 256>}, {pipeline_mode = #tpu.pipeline_mode<synchronous>, transform_indices = @transform_1, window_bounds = array<i64: 9, 8, 4>}, {transform_indices = @transform_2, window_bounds = array<i64: 1, 4, 8, 128>}, {transform_indices = @transform_3, window_bounds = array<i64: 1, 8, 2>}]} {
    %0 = tpu.iota {dimensions = array<i32: 1>} : vector<1x128xi32>
    %c56_i32 = arith.constant 56 : i32
    %1 = vector.broadcast %c56_i32 : i32 to vector<1x128xi32>
    %2 = arith.cmpi slt, %0, %1 : vector<1x128xi32>
    %c8_i32 = arith.constant 8 : i32
    %c0_i32 = arith.constant 0 : i32
    %3 = arith.cmpi eq, %c8_i32, %c0_i32 : i32
    %c1_i32 = arith.constant 1 : i32
    %4 = arith.select %3, %c1_i32, %c8_i32 : i32
    %5 = vector.broadcast %4 : i32 to vector<1x128xi32>
    %6 = arith.remsi %0, %5 : vector<1x128xi32>
    %c0_i32_0 = arith.constant 0 : i32
    %7 = vector.broadcast %c0_i32_0 : i32 to vector<1x128xi32>
    %8 = arith.cmpi ne, %6, %7 : vector<1x128xi32>
    %c0_i32_1 = arith.constant 0 : i32
    %9 = vector.broadcast %c0_i32_1 : i32 to vector<1x128xi32>
    %10 = arith.cmpi slt, %6, %9 : vector<1x128xi32>
    %c0_i32_2 = arith.constant 0 : i32
    %11 = arith.cmpi slt, %4, %c0_i32_2 : i32
    %12 = vector.broadcast %11 : i1 to vector<1x128xi1>
    %13 = vector.broadcast %12 : vector<1x128xi1> to vector<1x128xi1>
    %14 = arith.xori %10, %13 : vector<1x128xi1>
    %15 = arith.andi %14, %8 : vector<1x128xi1>
    %16 = vector.broadcast %4 : i32 to vector<1x128xi32>
    %17 = arith.addi %6, %16 : vector<1x128xi32>
    %18 = arith.select %15, %17, %6 : vector<1x128xi1>, vector<1x128xi32>
    %c7_i32 = arith.constant 7 : i32
    %19 = vector.broadcast %c7_i32 : i32 to vector<1x128xi32>
    %20 = arith.cmpi slt, %18, %19 : vector<1x128xi32>
    %21 = arith.andi %2, %20 : vector<1x128xi1>
    %22 = arith.extui %21 : vector<1x128xi1> to vector<1x128xi32>
    %23 = arith.sitofp %22 : vector<1x128xi32> to vector<1x128xf32>
    %cst = arith.constant 0.000000e+00 : f32
    %24 = vector.broadcast %cst : f32 to vector<8x1xf32>
    %cst_3 = arith.constant 0.000000e+00 : f32
    %25 = vector.broadcast %cst_3 : f32 to vector<8x1xf32>
    %cst_4 = arith.constant 0.000000e+00 : f32
    %26 = vector.broadcast %cst_4 : f32 to vector<8x128xf32>
    %c0 = arith.constant 0 : index
    %c0_5 = arith.constant 0 : index
    %c0_6 = arith.constant 0 : index
    %c0_7 = arith.constant 0 : index
    %c0_8 = arith.constant 0 : index
    %27 = vector.load %arg1[%c0, %c0_5, %c0_6, %c0_7, %c0_8] : memref<1x2x2x4x256xbf16, #tpu.memory_space<vmem>>, vector<1x1x1x4x128xbf16>
    %28 = vector.shape_cast %27 : vector<1x1x1x4x128xbf16> to vector<4x128xbf16>
    %c0_9 = arith.constant 0 : index
    %c0_10 = arith.constant 0 : index
    %c0_11 = arith.constant 0 : index
    %29 = vector.load %arg2[%c0_9, %c0_10, %c0_11] : memref<9x8x4xbf16, #tpu.memory_space<vmem>>, vector<1x8x4xbf16>
    %30 = vector.shape_cast %29 : vector<1x8x4xbf16> to vector<8x4xbf16>
    %cst_12 = arith.constant dense<0.000000e+00> : vector<8x128xf32>
    %31 = tpu.matmul %30, %28, %cst_12 {dimension_numbers = #tpu.dot_dimension_numbers<[1], [0], [0], [1], [0, 0, 1, 1], [], []>} : vector<8x4xbf16>, vector<4x128xbf16>, vector<8x128xf32> -> vector<8x128xf32>
    %32 = arith.addf %26, %31 : vector<8x128xf32>
    %c0_13 = arith.constant 0 : index
    %c0_14 = arith.constant 0 : index
    %c1 = arith.constant 1 : index
    %c0_15 = arith.constant 0 : index
    %c0_16 = arith.constant 0 : index
    %33 = vector.load %arg1[%c0_13, %c0_14, %c1, %c0_15, %c0_16] : memref<1x2x2x4x256xbf16, #tpu.memory_space<vmem>>, vector<1x1x1x4x128xbf16>
    %34 = vector.shape_cast %33 : vector<1x1x1x4x128xbf16> to vector<4x128xbf16>
    %c1_17 = arith.constant 1 : index
    %c0_18 = arith.constant 0 : index
    %c0_19 = arith.constant 0 : index
    %35 = vector.load %arg2[%c1_17, %c0_18, %c0_19] : memref<9x8x4xbf16, #tpu.memory_space<vmem>>, vector<1x8x4xbf16>
    %36 = vector.shape_cast %35 : vector<1x8x4xbf16> to vector<8x4xbf16>
    %cst_20 = arith.constant dense<0.000000e+00> : vector<8x128xf32>
    %37 = tpu.matmul %36, %34, %cst_20 {dimension_numbers = #tpu.dot_dimension_numbers<[1], [0], [0], [1], [0, 0, 1, 1], [], []>} : vector<8x4xbf16>, vector<4x128xbf16>, vector<8x128xf32> -> vector<8x128xf32>
    %38 = arith.addf %32, %37 : vector<8x128xf32>
    %c0_21 = arith.constant 0 : index
    %c0_22 = arith.constant 0 : index
    %c0_23 = arith.constant 0 : index
    %c0_24 = arith.constant 0 : index
    %c1_25 = arith.constant 1 : index
    %39 = vector.load %arg1[%c0_21, %c0_22, %c0_23, %c0_24, %c1_25] : memref<1x2x2x4x256xbf16, #tpu.memory_space<vmem>>, vector<1x1x1x4x128xbf16>
    %40 = vector.shape_cast %39 : vector<1x1x1x4x128xbf16> to vector<4x128xbf16>
    %c2 = arith.constant 2 : index
    %c0_26 = arith.constant 0 : index
    %c0_27 = arith.constant 0 : index
    %41 = vector.load %arg2[%c2, %c0_26, %c0_27] : memref<9x8x4xbf16, #tpu.memory_space<vmem>>, vector<1x8x4xbf16>
    %42 = vector.shape_cast %41 : vector<1x8x4xbf16> to vector<8x4xbf16>
    %cst_28 = arith.constant dense<0.000000e+00> : vector<8x128xf32>
    %43 = tpu.matmul %42, %40, %cst_28 {dimension_numbers = #tpu.dot_dimension_numbers<[1], [0], [0], [1], [0, 0, 1, 1], [], []>} : vector<8x4xbf16>, vector<4x128xbf16>, vector<8x128xf32> -> vector<8x128xf32>
    %44 = arith.addf %38, %43 : vector<8x128xf32>
    %c0_29 = arith.constant 0 : index
    %c1_30 = arith.constant 1 : index
    %c0_31 = arith.constant 0 : index
    %c0_32 = arith.constant 0 : index
    %c0_33 = arith.constant 0 : index
    %45 = vector.load %arg1[%c0_29, %c1_30, %c0_31, %c0_32, %c0_33] : memref<1x2x2x4x256xbf16, #tpu.memory_space<vmem>>, vector<1x1x1x4x128xbf16>
    %46 = vector.shape_cast %45 : vector<1x1x1x4x128xbf16> to vector<4x128xbf16>
    %c3 = arith.constant 3 : index
    %c0_34 = arith.constant 0 : index
    %c0_35 = arith.constant 0 : index
    %47 = vector.load %arg2[%c3, %c0_34, %c0_35] : memref<9x8x4xbf16, #tpu.memory_space<vmem>>, vector<1x8x4xbf16>
    %48 = vector.shape_cast %47 : vector<1x8x4xbf16> to vector<8x4xbf16>
    %cst_36 = arith.constant dense<0.000000e+00> : vector<8x128xf32>
    %49 = tpu.matmul %48, %46, %cst_36 {dimension_numbers = #tpu.dot_dimension_numbers<[1], [0], [0], [1], [0, 0, 1, 1], [], []>} : vector<8x4xbf16>, vector<4x128xbf16>, vector<8x128xf32> -> vector<8x128xf32>
    %50 = arith.addf %44, %49 : vector<8x128xf32>
    %c0_37 = arith.constant 0 : index
    %c1_38 = arith.constant 1 : index
    %c1_39 = arith.constant 1 : index
    %c0_40 = arith.constant 0 : index
    %c0_41 = arith.constant 0 : index
    %51 = vector.load %arg1[%c0_37, %c1_38, %c1_39, %c0_40, %c0_41] : memref<1x2x2x4x256xbf16, #tpu.memory_space<vmem>>, vector<1x1x1x4x128xbf16>
    %52 = vector.shape_cast %51 : vector<1x1x1x4x128xbf16> to vector<4x128xbf16>
    %c4 = arith.constant 4 : index
    %c0_42 = arith.constant 0 : index
    %c0_43 = arith.constant 0 : index
    %53 = vector.load %arg2[%c4, %c0_42, %c0_43] : memref<9x8x4xbf16, #tpu.memory_space<vmem>>, vector<1x8x4xbf16>
    %54 = vector.shape_cast %53 : vector<1x8x4xbf16> to vector<8x4xbf16>
    %cst_44 = arith.constant dense<0.000000e+00> : vector<8x128xf32>
    %55 = tpu.matmul %54, %52, %cst_44 {dimension_numbers = #tpu.dot_dimension_numbers<[1], [0], [0], [1], [0, 0, 1, 1], [], []>} : vector<8x4xbf16>, vector<4x128xbf16>, vector<8x128xf32> -> vector<8x128xf32>
    %56 = arith.addf %50, %55 : vector<8x128xf32>
    %c0_45 = arith.constant 0 : index
    %c1_46 = arith.constant 1 : index
    %c0_47 = arith.constant 0 : index
    %c0_48 = arith.constant 0 : index
    %c1_49 = arith.constant 1 : index
    %57 = vector.load %arg1[%c0_45, %c1_46, %c0_47, %c0_48, %c1_49] : memref<1x2x2x4x256xbf16, #tpu.memory_space<vmem>>, vector<1x1x1x4x128xbf16>
    %58 = vector.shape_cast %57 : vector<1x1x1x4x128xbf16> to vector<4x128xbf16>
    %c5 = arith.constant 5 : index
    %c0_50 = arith.constant 0 : index
    %c0_51 = arith.constant 0 : index
    %59 = vector.load %arg2[%c5, %c0_50, %c0_51] : memref<9x8x4xbf16, #tpu.memory_space<vmem>>, vector<1x8x4xbf16>
    %60 = vector.shape_cast %59 : vector<1x8x4xbf16> to vector<8x4xbf16>
    %cst_52 = arith.constant dense<0.000000e+00> : vector<8x128xf32>
    %61 = tpu.matmul %60, %58, %cst_52 {dimension_numbers = #tpu.dot_dimension_numbers<[1], [0], [0], [1], [0, 0, 1, 1], [], []>} : vector<8x4xbf16>, vector<4x128xbf16>, vector<8x128xf32> -> vector<8x128xf32>
    %62 = arith.addf %56, %61 : vector<8x128xf32>
    %c0_53 = arith.constant 0 : index
    %c0_54 = arith.constant 0 : index
    %c0_55 = arith.constant 0 : index
    %c0_56 = arith.constant 0 : index
    %c8 = arith.constant 8 : index
    %63 = vector.load %arg1[%c0_53, %c0_54, %c0_55, %c0_56, %c8] : memref<1x2x2x4x256xbf16, #tpu.memory_space<vmem>>, vector<1x1x1x4x128xbf16>
    %64 = vector.shape_cast %63 : vector<1x1x1x4x128xbf16> to vector<4x128xbf16>
    %c6 = arith.constant 6 : index
    %c0_57 = arith.constant 0 : index
    %c0_58 = arith.constant 0 : index
    %65 = vector.load %arg2[%c6, %c0_57, %c0_58] : memref<9x8x4xbf16, #tpu.memory_space<vmem>>, vector<1x8x4xbf16>
    %66 = vector.shape_cast %65 : vector<1x8x4xbf16> to vector<8x4xbf16>
    %cst_59 = arith.constant dense<0.000000e+00> : vector<8x128xf32>
    %67 = tpu.matmul %66, %64, %cst_59 {dimension_numbers = #tpu.dot_dimension_numbers<[1], [0], [0], [1], [0, 0, 1, 1], [], []>} : vector<8x4xbf16>, vector<4x128xbf16>, vector<8x128xf32> -> vector<8x128xf32>
    %68 = arith.addf %62, %67 : vector<8x128xf32>
    %c0_60 = arith.constant 0 : index
    %c0_61 = arith.constant 0 : index
    %c1_62 = arith.constant 1 : index
    %c0_63 = arith.constant 0 : index
    %c8_64 = arith.constant 8 : index
    %69 = vector.load %arg1[%c0_60, %c0_61, %c1_62, %c0_63, %c8_64] : memref<1x2x2x4x256xbf16, #tpu.memory_space<vmem>>, vector<1x1x1x4x128xbf16>
    %70 = vector.shape_cast %69 : vector<1x1x1x4x128xbf16> to vector<4x128xbf16>
    %c7 = arith.constant 7 : index
    %c0_65 = arith.constant 0 : index
    %c0_66 = arith.constant 0 : index
    %71 = vector.load %arg2[%c7, %c0_65, %c0_66] : memref<9x8x4xbf16, #tpu.memory_space<vmem>>, vector<1x8x4xbf16>
    %72 = vector.shape_cast %71 : vector<1x8x4xbf16> to vector<8x4xbf16>
    %cst_67 = arith.constant dense<0.000000e+00> : vector<8x128xf32>
    %73 = tpu.matmul %72, %70, %cst_67 {dimension_numbers = #tpu.dot_dimension_numbers<[1], [0], [0], [1], [0, 0, 1, 1], [], []>} : vector<8x4xbf16>, vector<4x128xbf16>, vector<8x128xf32> -> vector<8x128xf32>
    %74 = arith.addf %68, %73 : vector<8x128xf32>
    %c0_68 = arith.constant 0 : index
    %c0_69 = arith.constant 0 : index
    %c0_70 = arith.constant 0 : index
    %c0_71 = arith.constant 0 : index
    %c9 = arith.constant 9 : index
    %75 = vector.load %arg1[%c0_68, %c0_69, %c0_70, %c0_71, %c9] : memref<1x2x2x4x256xbf16, #tpu.memory_space<vmem>>, vector<1x1x1x4x128xbf16>
    %76 = vector.shape_cast %75 : vector<1x1x1x4x128xbf16> to vector<4x128xbf16>
    %c8_72 = arith.constant 8 : index
    %c0_73 = arith.constant 0 : index
    %c0_74 = arith.constant 0 : index
    %77 = vector.load %arg2[%c8_72, %c0_73, %c0_74] : memref<9x8x4xbf16, #tpu.memory_space<vmem>>, vector<1x8x4xbf16>
    %78 = vector.shape_cast %77 : vector<1x8x4xbf16> to vector<8x4xbf16>
    %cst_75 = arith.constant dense<0.000000e+00> : vector<8x128xf32>
    %79 = tpu.matmul %78, %76, %cst_75 {dimension_numbers = #tpu.dot_dimension_numbers<[1], [0], [0], [1], [0, 0, 1, 1], [], []>} : vector<8x4xbf16>, vector<4x128xbf16>, vector<8x128xf32> -> vector<8x128xf32>
    %80 = arith.addf %74, %79 : vector<8x128xf32>
    %81 = vector.broadcast %23 : vector<1x128xf32> to vector<8x128xf32>
    %82 = arith.mulf %80, %81 : vector<8x128xf32>
    %83 = arith.truncf %82 : vector<8x128xf32> to vector<8x128xbf16>
    %c0_76 = arith.constant 0 : index
    %c0_77 = arith.constant 0 : index
    %c0_78 = arith.constant 0 : index
    %c0_79 = arith.constant 0 : index
    %84 = vector.load %arg3[%c0_76, %c0_77, %c0_78, %c0_79] : memref<1x4x8x128xbf16, #tpu.memory_space<vmem>>, vector<1x1x8x128xbf16>
    %85 = vector.shape_cast %84 : vector<1x1x8x128xbf16> to vector<8x128xbf16>
    %86 = vector.shape_cast %83 : vector<8x128xbf16> to vector<1x1x8x128xbf16>
    tpu.vector_store %arg3[%c0_76, %c0_77, %c0_78, %c0_79], %86 {strides = array<i32>} : memref<1x4x8x128xbf16, #tpu.memory_space<vmem>>, vector<1x1x8x128xbf16>,
    %cst_80 = arith.constant dense<0.000000e+00> : vector<8xf32>
    %87 = vector.multi_reduction <add>, %82, %cst_80 [1] : vector<8x128xf32> to vector<8xf32>
    %88 = vector.shape_cast %87 : vector<8xf32> to vector<8x1xf32>
    %89 = arith.addf %24, %88 : vector<8x1xf32>
    %90 = arith.mulf %82, %82 : vector<8x128xf32>
    %cst_81 = arith.constant dense<0.000000e+00> : vector<8xf32>
    %91 = vector.multi_reduction <add>, %90, %cst_81 [1] : vector<8x128xf32> to vector<8xf32>
    %92 = vector.shape_cast %91 : vector<8xf32> to vector<8x1xf32>
    %93 = arith.addf %25, %92 : vector<8x1xf32>
    %cst_82 = arith.constant 0.000000e+00 : f32
    %94 = vector.broadcast %cst_82 : f32 to vector<8x128xf32>
    %c0_83 = arith.constant 0 : index
    %c0_84 = arith.constant 0 : index
    %c1_85 = arith.constant 1 : index
    %c0_86 = arith.constant 0 : index
    %c0_87 = arith.constant 0 : index
    %95 = vector.load %arg1[%c0_83, %c0_84, %c1_85, %c0_86, %c0_87] : memref<1x2x2x4x256xbf16, #tpu.memory_space<vmem>>, vector<1x1x1x4x128xbf16>
    %96 = vector.shape_cast %95 : vector<1x1x1x4x128xbf16> to vector<4x128xbf16>
    %c0_88 = arith.constant 0 : index
    %c0_89 = arith.constant 0 : index
    %c0_90 = arith.constant 0 : index
    %97 = vector.load %arg2[%c0_88, %c0_89, %c0_90] : memref<9x8x4xbf16, #tpu.memory_space<vmem>>, vector<1x8x4xbf16>
    %98 = vector.shape_cast %97 : vector<1x8x4xbf16> to vector<8x4xbf16>
    %cst_91 = arith.constant dense<0.000000e+00> : vector<8x128xf32>
    %99 = tpu.matmul %98, %96, %cst_91 {dimension_numbers = #tpu.dot_dimension_numbers<[1], [0], [0], [1], [0, 0, 1, 1], [], []>} : vector<8x4xbf16>, vector<4x128xbf16>, vector<8x128xf32> -> vector<8x128xf32>
    %100 = arith.addf %94, %99 : vector<8x128xf32>
    %c0_92 = arith.constant 0 : index
    %c0_93 = arith.constant 0 : index
    %c0_94 = arith.constant 0 : index
    %c0_95 = arith.constant 0 : index
    %c1_96 = arith.constant 1 : index
    %101 = vector.load %arg1[%c0_92, %c0_93, %c0_94, %c0_95, %c1_96] : memref<1x2x2x4x256xbf16, #tpu.memory_space<vmem>>, vector<1x1x1x4x128xbf16>
    %102 = vector.shape_cast %101 : vector<1x1x1x4x128xbf16> to vector<4x128xbf16>
    %c1_97 = arith.constant 1 : index
    %c0_98 = arith.constant 0 : index
    %c0_99 = arith.constant 0 : index
    %103 = vector.load %arg2[%c1_97, %c0_98, %c0_99] : memref<9x8x4xbf16, #tpu.memory_space<vmem>>, vector<1x8x4xbf16>
    %104 = vector.shape_cast %103 : vector<1x8x4xbf16> to vector<8x4xbf16>
    %cst_100 = arith.constant dense<0.000000e+00> : vector<8x128xf32>
    %105 = tpu.matmul %104, %102, %cst_100 {dimension_numbers = #tpu.dot_dimension_numbers<[1], [0], [0], [1], [0, 0, 1, 1], [], []>} : vector<8x4xbf16>, vector<4x128xbf16>, vector<8x128xf32> -> vector<8x128xf32>
    %106 = arith.addf %100, %105 : vector<8x128xf32>
    %c0_101 = arith.constant 0 : index
    %c0_102 = arith.constant 0 : index
    %c1_103 = arith.constant 1 : index
    %c0_104 = arith.constant 0 : index
    %c1_105 = arith.constant 1 : index
    %107 = vector.load %arg1[%c0_101, %c0_102, %c1_103, %c0_104, %c1_105] : memref<1x2x2x4x256xbf16, #tpu.memory_space<vmem>>, vector<1x1x1x4x128xbf16>
    %108 = vector.shape_cast %107 : vector<1x1x1x4x128xbf16> to vector<4x128xbf16>
    %c2_106 = arith.constant 2 : index
    %c0_107 = arith.constant 0 : index
    %c0_108 = arith.constant 0 : index
    %109 = vector.load %arg2[%c2_106, %c0_107, %c0_108] : memref<9x8x4xbf16, #tpu.memory_space<vmem>>, vector<1x8x4xbf16>
    %110 = vector.shape_cast %109 : vector<1x8x4xbf16> to vector<8x4xbf16>
    %cst_109 = arith.constant dense<0.000000e+00> : vector<8x128xf32>
    %111 = tpu.matmul %110, %108, %cst_109 {dimension_numbers = #tpu.dot_dimension_numbers<[1], [0], [0], [1], [0, 0, 1, 1], [], []>} : vector<8x4xbf16>, vector<4x128xbf16>, vector<8x128xf32> -> vector<8x128xf32>
    %112 = arith.addf %106, %111 : vector<8x128xf32>
    %c0_110 = arith.constant 0 : index
    %c1_111 = arith.constant 1 : index
    %c1_112 = arith.constant 1 : index
    %c0_113 = arith.constant 0 : index
    %c0_114 = arith.constant 0 : index
    %113 = vector.load %arg1[%c0_110, %c1_111, %c1_112, %c0_113, %c0_114] : memref<1x2x2x4x256xbf16, #tpu.memory_space<vmem>>, vector<1x1x1x4x128xbf16>
    %114 = vector.shape_cast %113 : vector<1x1x1x4x128xbf16> to vector<4x128xbf16>
    %c3_115 = arith.constant 3 : index
    %c0_116 = arith.constant 0 : index
    %c0_117 = arith.constant 0 : index
    %115 = vector.load %arg2[%c3_115, %c0_116, %c0_117] : memref<9x8x4xbf16, #tpu.memory_space<vmem>>, vector<1x8x4xbf16>
    %116 = vector.shape_cast %115 : vector<1x8x4xbf16> to vector<8x4xbf16>
    %cst_118 = arith.constant dense<0.000000e+00> : vector<8x128xf32>
    %117 = tpu.matmul %116, %114, %cst_118 {dimension_numbers = #tpu.dot_dimension_numbers<[1], [0], [0], [1], [0, 0, 1, 1], [], []>} : vector<8x4xbf16>, vector<4x128xbf16>, vector<8x128xf32> -> vector<8x128xf32>
    %118 = arith.addf %112, %117 : vector<8x128xf32>
    %c0_119 = arith.constant 0 : index
    %c1_120 = arith.constant 1 : index
    %c0_121 = arith.constant 0 : index
    %c0_122 = arith.constant 0 : index
    %c1_123 = arith.constant 1 : index
    %119 = vector.load %arg1[%c0_119, %c1_120, %c0_121, %c0_122, %c1_123] : memref<1x2x2x4x256xbf16, #tpu.memory_space<vmem>>, vector<1x1x1x4x128xbf16>
    %120 = vector.shape_cast %119 : vector<1x1x1x4x128xbf16> to vector<4x128xbf16>
    %c4_124 = arith.constant 4 : index
    %c0_125 = arith.constant 0 : index
    %c0_126 = arith.constant 0 : index
    %121 = vector.load %arg2[%c4_124, %c0_125, %c0_126] : memref<9x8x4xbf16, #tpu.memory_space<vmem>>, vector<1x8x4xbf16>
    %122 = vector.shape_cast %121 : vector<1x8x4xbf16> to vector<8x4xbf16>
    %cst_127 = arith.constant dense<0.000000e+00> : vector<8x128xf32>
    %123 = tpu.matmul %122, %120, %cst_127 {dimension_numbers = #tpu.dot_dimension_numbers<[1], [0], [0], [1], [0, 0, 1, 1], [], []>} : vector<8x4xbf16>, vector<4x128xbf16>, vector<8x128xf32> -> vector<8x128xf32>
    %124 = arith.addf %118, %123 : vector<8x128xf32>
    %c0_128 = arith.constant 0 : index
    %c1_129 = arith.constant 1 : index
    %c1_130 = arith.constant 1 : index
    %c0_131 = arith.constant 0 : index
    %c1_132 = arith.constant 1 : index
    %125 = vector.load %arg1[%c0_128, %c1_129, %c1_130, %c0_131, %c1_132] : memref<1x2x2x4x256xbf16, #tpu.memory_space<vmem>>, vector<1x1x1x4x128xbf16>
    %126 = vector.shape_cast %125 : vector<1x1x1x4x128xbf16> to vector<4x128xbf16>
    %c5_133 = arith.constant 5 : index
    %c0_134 = arith.constant 0 : index
    %c0_135 = arith.constant 0 : index
    %127 = vector.load %arg2[%c5_133, %c0_134, %c0_135] : memref<9x8x4xbf16, #tpu.memory_space<vmem>>, vector<1x8x4xbf16>
    %128 = vector.shape_cast %127 : vector<1x8x4xbf16> to vector<8x4xbf16>
    %cst_136 = arith.constant dense<0.000000e+00> : vector<8x128xf32>
    %129 = tpu.matmul %128, %126, %cst_136 {dimension_numbers = #tpu.dot_dimension_numbers<[1], [0], [0], [1], [0, 0, 1, 1], [], []>} : vector<8x4xbf16>, vector<4x128xbf16>, vector<8x128xf32> -> vector<8x128xf32>
    %130 = arith.addf %124, %129 : vector<8x128xf32>
    %c0_137 = arith.constant 0 : index
    %c0_138 = arith.constant 0 : index
    %c1_139 = arith.constant 1 : index
    %c0_140 = arith.constant 0 : index
    %c8_141 = arith.constant 8 : index
    %131 = vector.load %arg1[%c0_137, %c0_138, %c1_139, %c0_140, %c8_141] : memref<1x2x2x4x256xbf16, #tpu.memory_space<vmem>>, vector<1x1x1x4x128xbf16>
    %132 = vector.shape_cast %131 : vector<1x1x1x4x128xbf16> to vector<4x128xbf16>
    %c6_142 = arith.constant 6 : index
    %c0_143 = arith.constant 0 : index
    %c0_144 = arith.constant 0 : index
    %133 = vector.load %arg2[%c6_142, %c0_143, %c0_144] : memref<9x8x4xbf16, #tpu.memory_space<vmem>>, vector<1x8x4xbf16>
    %134 = vector.shape_cast %133 : vector<1x8x4xbf16> to vector<8x4xbf16>
    %cst_145 = arith.constant dense<0.000000e+00> : vector<8x128xf32>
    %135 = tpu.matmul %134, %132, %cst_145 {dimension_numbers = #tpu.dot_dimension_numbers<[1], [0], [0], [1], [0, 0, 1, 1], [], []>} : vector<8x4xbf16>, vector<4x128xbf16>, vector<8x128xf32> -> vector<8x128xf32>
    %136 = arith.addf %130, %135 : vector<8x128xf32>
    %c0_146 = arith.constant 0 : index
    %c0_147 = arith.constant 0 : index
    %c0_148 = arith.constant 0 : index
    %c0_149 = arith.constant 0 : index
    %c9_150 = arith.constant 9 : index
    %137 = vector.load %arg1[%c0_146, %c0_147, %c0_148, %c0_149, %c9_150] : memref<1x2x2x4x256xbf16, #tpu.memory_space<vmem>>, vector<1x1x1x4x128xbf16>
    %138 = vector.shape_cast %137 : vector<1x1x1x4x128xbf16> to vector<4x128xbf16>
    %c7_151 = arith.constant 7 : index
    %c0_152 = arith.constant 0 : index
    %c0_153 = arith.constant 0 : index
    %139 = vector.load %arg2[%c7_151, %c0_152, %c0_153] : memref<9x8x4xbf16, #tpu.memory_space<vmem>>, vector<1x8x4xbf16>
    %140 = vector.shape_cast %139 : vector<1x8x4xbf16> to vector<8x4xbf16>
    %cst_154 = arith.constant dense<0.000000e+00> : vector<8x128xf32>
    %141 = tpu.matmul %140, %138, %cst_154 {dimension_numbers = #tpu.dot_dimension_numbers<[1], [0], [0], [1], [0, 0, 1, 1], [], []>} : vector<8x4xbf16>, vector<4x128xbf16>, vector<8x128xf32> -> vector<8x128xf32>
    %142 = arith.addf %136, %141 : vector<8x128xf32>
    %c0_155 = arith.constant 0 : index
    %c0_156 = arith.constant 0 : index
    %c1_157 = arith.constant 1 : index
    %c0_158 = arith.constant 0 : index
    %c9_159 = arith.constant 9 : index
    %143 = vector.load %arg1[%c0_155, %c0_156, %c1_157, %c0_158, %c9_159] : memref<1x2x2x4x256xbf16, #tpu.memory_space<vmem>>, vector<1x1x1x4x128xbf16>
    %144 = vector.shape_cast %143 : vector<1x1x1x4x128xbf16> to vector<4x128xbf16>
    %c8_160 = arith.constant 8 : index
    %c0_161 = arith.constant 0 : index
    %c0_162 = arith.constant 0 : index
    %145 = vector.load %arg2[%c8_160, %c0_161, %c0_162] : memref<9x8x4xbf16, #tpu.memory_space<vmem>>, vector<1x8x4xbf16>
    %146 = vector.shape_cast %145 : vector<1x8x4xbf16> to vector<8x4xbf16>
    %cst_163 = arith.constant dense<0.000000e+00> : vector<8x128xf32>
    %147 = tpu.matmul %146, %144, %cst_163 {dimension_numbers = #tpu.dot_dimension_numbers<[1], [0], [0], [1], [0, 0, 1, 1], [], []>} : vector<8x4xbf16>, vector<4x128xbf16>, vector<8x128xf32> -> vector<8x128xf32>
    %148 = arith.addf %142, %147 : vector<8x128xf32>
    %149 = vector.broadcast %23 : vector<1x128xf32> to vector<8x128xf32>
    %150 = arith.mulf %148, %149 : vector<8x128xf32>
    %151 = arith.truncf %150 : vector<8x128xf32> to vector<8x128xbf16>
    %c0_164 = arith.constant 0 : index
    %c1_165 = arith.constant 1 : index
    %c0_166 = arith.constant 0 : index
    %c0_167 = arith.constant 0 : index
    %152 = vector.load %arg3[%c0_164, %c1_165, %c0_166, %c0_167] : memref<1x4x8x128xbf16, #tpu.memory_space<vmem>>, vector<1x1x8x128xbf16>
    %153 = vector.shape_cast %152 : vector<1x1x8x128xbf16> to vector<8x128xbf16>
    %154 = vector.shape_cast %151 : vector<8x128xbf16> to vector<1x1x8x128xbf16>
    tpu.vector_store %arg3[%c0_164, %c1_165, %c0_166, %c0_167], %154 {strides = array<i32>} : memref<1x4x8x128xbf16, #tpu.memory_space<vmem>>, vector<1x1x8x128xbf16>,
    %cst_168 = arith.constant dense<0.000000e+00> : vector<8xf32>
    %155 = vector.multi_reduction <add>, %150, %cst_168 [1] : vector<8x128xf32> to vector<8xf32>
    %156 = vector.shape_cast %155 : vector<8xf32> to vector<8x1xf32>
    %157 = arith.addf %89, %156 : vector<8x1xf32>
    %158 = arith.mulf %150, %150 : vector<8x128xf32>
    %cst_169 = arith.constant dense<0.000000e+00> : vector<8xf32>
    %159 = vector.multi_reduction <add>, %158, %cst_169 [1] : vector<8x128xf32> to vector<8xf32>
    %160 = vector.shape_cast %159 : vector<8xf32> to vector<8x1xf32>
    %161 = arith.addf %93, %160 : vector<8x1xf32>
    %cst_170 = arith.constant 0.000000e+00 : f32
    %162 = vector.broadcast %cst_170 : f32 to vector<8x128xf32>
    %c0_171 = arith.constant 0 : index
    %c1_172 = arith.constant 1 : index
    %c0_173 = arith.constant 0 : index
    %c0_174 = arith.constant 0 : index
    %c0_175 = arith.constant 0 : index
    %163 = vector.load %arg1[%c0_171, %c1_172, %c0_173, %c0_174, %c0_175] : memref<1x2x2x4x256xbf16, #tpu.memory_space<vmem>>, vector<1x1x1x4x128xbf16>
    %164 = vector.shape_cast %163 : vector<1x1x1x4x128xbf16> to vector<4x128xbf16>
    %c0_176 = arith.constant 0 : index
    %c0_177 = arith.constant 0 : index
    %c0_178 = arith.constant 0 : index
    %165 = vector.load %arg2[%c0_176, %c0_177, %c0_178] : memref<9x8x4xbf16, #tpu.memory_space<vmem>>, vector<1x8x4xbf16>
    %166 = vector.shape_cast %165 : vector<1x8x4xbf16> to vector<8x4xbf16>
    %cst_179 = arith.constant dense<0.000000e+00> : vector<8x128xf32>
    %167 = tpu.matmul %166, %164, %cst_179 {dimension_numbers = #tpu.dot_dimension_numbers<[1], [0], [0], [1], [0, 0, 1, 1], [], []>} : vector<8x4xbf16>, vector<4x128xbf16>, vector<8x128xf32> -> vector<8x128xf32>
    %168 = arith.addf %162, %167 : vector<8x128xf32>
    %c0_180 = arith.constant 0 : index
    %c1_181 = arith.constant 1 : index
    %c1_182 = arith.constant 1 : index
    %c0_183 = arith.constant 0 : index
    %c0_184 = arith.constant 0 : index
    %169 = vector.load %arg1[%c0_180, %c1_181, %c1_182, %c0_183, %c0_184] : memref<1x2x2x4x256xbf16, #tpu.memory_space<vmem>>, vector<1x1x1x4x128xbf16>
    %170 = vector.shape_cast %169 : vector<1x1x1x4x128xbf16> to vector<4x128xbf16>
    %c1_185 = arith.constant 1 : index
    %c0_186 = arith.constant 0 : index
    %c0_187 = arith.constant 0 : index
    %171 = vector.load %arg2[%c1_185, %c0_186, %c0_187] : memref<9x8x4xbf16, #tpu.memory_space<vmem>>, vector<1x8x4xbf16>
    %172 = vector.shape_cast %171 : vector<1x8x4xbf16> to vector<8x4xbf16>
    %cst_188 = arith.constant dense<0.000000e+00> : vector<8x128xf32>
    %173 = tpu.matmul %172, %170, %cst_188 {dimension_numbers = #tpu.dot_dimension_numbers<[1], [0], [0], [1], [0, 0, 1, 1], [], []>} : vector<8x4xbf16>, vector<4x128xbf16>, vector<8x128xf32> -> vector<8x128xf32>
    %174 = arith.addf %168, %173 : vector<8x128xf32>
    %c0_189 = arith.constant 0 : index
    %c1_190 = arith.constant 1 : index
    %c0_191 = arith.constant 0 : index
    %c0_192 = arith.constant 0 : index
    %c1_193 = arith.constant 1 : index
    %175 = vector.load %arg1[%c0_189, %c1_190, %c0_191, %c0_192, %c1_193] : memref<1x2x2x4x256xbf16, #tpu.memory_space<vmem>>, vector<1x1x1x4x128xbf16>
    %176 = vector.shape_cast %175 : vector<1x1x1x4x128xbf16> to vector<4x128xbf16>
    %c2_194 = arith.constant 2 : index
    %c0_195 = arith.constant 0 : index
    %c0_196 = arith.constant 0 : index
    %177 = vector.load %arg2[%c2_194, %c0_195, %c0_196] : memref<9x8x4xbf16, #tpu.memory_space<vmem>>, vector<1x8x4xbf16>
    %178 = vector.shape_cast %177 : vector<1x8x4xbf16> to vector<8x4xbf16>
    %cst_197 = arith.constant dense<0.000000e+00> : vector<8x128xf32>
    %179 = tpu.matmul %178, %176, %cst_197 {dimension_numbers = #tpu.dot_dimension_numbers<[1], [0], [0], [1], [0, 0, 1, 1], [], []>} : vector<8x4xbf16>, vector<4x128xbf16>, vector<8x128xf32> -> vector<8x128xf32>
    %180 = arith.addf %174, %179 : vector<8x128xf32>
    %c0_198 = arith.constant 0 : index
    %c0_199 = arith.constant 0 : index
    %c0_200 = arith.constant 0 : index
    %c0_201 = arith.constant 0 : index
    %c8_202 = arith.constant 8 : index
    %181 = vector.load %arg1[%c0_198, %c0_199, %c0_200, %c0_201, %c8_202] : memref<1x2x2x4x256xbf16, #tpu.memory_space<vmem>>, vector<1x1x1x4x128xbf16>
    %182 = vector.shape_cast %181 : vector<1x1x1x4x128xbf16> to vector<4x128xbf16>
    %c3_203 = arith.constant 3 : index
    %c0_204 = arith.constant 0 : index
    %c0_205 = arith.constant 0 : index
    %183 = vector.load %arg2[%c3_203, %c0_204, %c0_205] : memref<9x8x4xbf16, #tpu.memory_space<vmem>>, vector<1x8x4xbf16>
    %184 = vector.shape_cast %183 : vector<1x8x4xbf16> to vector<8x4xbf16>
    %cst_206 = arith.constant dense<0.000000e+00> : vector<8x128xf32>
    %185 = tpu.matmul %184, %182, %cst_206 {dimension_numbers = #tpu.dot_dimension_numbers<[1], [0], [0], [1], [0, 0, 1, 1], [], []>} : vector<8x4xbf16>, vector<4x128xbf16>, vector<8x128xf32> -> vector<8x128xf32>
    %186 = arith.addf %180, %185 : vector<8x128xf32>
    %c0_207 = arith.constant 0 : index
    %c0_208 = arith.constant 0 : index
    %c1_209 = arith.constant 1 : index
    %c0_210 = arith.constant 0 : index
    %c8_211 = arith.constant 8 : index
    %187 = vector.load %arg1[%c0_207, %c0_208, %c1_209, %c0_210, %c8_211] : memref<1x2x2x4x256xbf16, #tpu.memory_space<vmem>>, vector<1x1x1x4x128xbf16>
    %188 = vector.shape_cast %187 : vector<1x1x1x4x128xbf16> to vector<4x128xbf16>
    %c4_212 = arith.constant 4 : index
    %c0_213 = arith.constant 0 : index
    %c0_214 = arith.constant 0 : index
    %189 = vector.load %arg2[%c4_212, %c0_213, %c0_214] : memref<9x8x4xbf16, #tpu.memory_space<vmem>>, vector<1x8x4xbf16>
    %190 = vector.shape_cast %189 : vector<1x8x4xbf16> to vector<8x4xbf16>
    %cst_215 = arith.constant dense<0.000000e+00> : vector<8x128xf32>
    %191 = tpu.matmul %190, %188, %cst_215 {dimension_numbers = #tpu.dot_dimension_numbers<[1], [0], [0], [1], [0, 0, 1, 1], [], []>} : vector<8x4xbf16>, vector<4x128xbf16>, vector<8x128xf32> -> vector<8x128xf32>
    %192 = arith.addf %186, %191 : vector<8x128xf32>
    %c0_216 = arith.constant 0 : index
    %c0_217 = arith.constant 0 : index
    %c0_218 = arith.constant 0 : index
    %c0_219 = arith.constant 0 : index
    %c9_220 = arith.constant 9 : index
    %193 = vector.load %arg1[%c0_216, %c0_217, %c0_218, %c0_219, %c9_220] : memref<1x2x2x4x256xbf16, #tpu.memory_space<vmem>>, vector<1x1x1x4x128xbf16>
    %194 = vector.shape_cast %193 : vector<1x1x1x4x128xbf16> to vector<4x128xbf16>
    %c5_221 = arith.constant 5 : index
    %c0_222 = arith.constant 0 : index
    %c0_223 = arith.constant 0 : index
    %195 = vector.load %arg2[%c5_221, %c0_222, %c0_223] : memref<9x8x4xbf16, #tpu.memory_space<vmem>>, vector<1x8x4xbf16>
    %196 = vector.shape_cast %195 : vector<1x8x4xbf16> to vector<8x4xbf16>
    %cst_224 = arith.constant dense<0.000000e+00> : vector<8x128xf32>
    %197 = tpu.matmul %196, %194, %cst_224 {dimension_numbers = #tpu.dot_dimension_numbers<[1], [0], [0], [1], [0, 0, 1, 1], [], []>} : vector<8x4xbf16>, vector<4x128xbf16>, vector<8x128xf32> -> vector<8x128xf32>
    %198 = arith.addf %192, %197 : vector<8x128xf32>
    %c0_225 = arith.constant 0 : index
    %c1_226 = arith.constant 1 : index
    %c0_227 = arith.constant 0 : index
    %c0_228 = arith.constant 0 : index
    %c8_229 = arith.constant 8 : index
    %199 = vector.load %arg1[%c0_225, %c1_226, %c0_227, %c0_228, %c8_229] : memref<1x2x2x4x256xbf16, #tpu.memory_space<vmem>>, vector<1x1x1x4x128xbf16>
    %200 = vector.shape_cast %199 : vector<1x1x1x4x128xbf16> to vector<4x128xbf16>
    %c6_230 = arith.constant 6 : index
    %c0_231 = arith.constant 0 : index
    %c0_232 = arith.constant 0 : index
    %201 = vector.load %arg2[%c6_230, %c0_231, %c0_232] : memref<9x8x4xbf16, #tpu.memory_space<vmem>>, vector<1x8x4xbf16>
    %202 = vector.shape_cast %201 : vector<1x8x4xbf16> to vector<8x4xbf16>
    %cst_233 = arith.constant dense<0.000000e+00> : vector<8x128xf32>
    %203 = tpu.matmul %202, %200, %cst_233 {dimension_numbers = #tpu.dot_dimension_numbers<[1], [0], [0], [1], [0, 0, 1, 1], [], []>} : vector<8x4xbf16>, vector<4x128xbf16>, vector<8x128xf32> -> vector<8x128xf32>
    %204 = arith.addf %198, %203 : vector<8x128xf32>
    %c0_234 = arith.constant 0 : index
    %c1_235 = arith.constant 1 : index
    %c1_236 = arith.constant 1 : index
    %c0_237 = arith.constant 0 : index
    %c8_238 = arith.constant 8 : index
    %205 = vector.load %arg1[%c0_234, %c1_235, %c1_236, %c0_237, %c8_238] : memref<1x2x2x4x256xbf16, #tpu.memory_space<vmem>>, vector<1x1x1x4x128xbf16>
    %206 = vector.shape_cast %205 : vector<1x1x1x4x128xbf16> to vector<4x128xbf16>
    %c7_239 = arith.constant 7 : index
    %c0_240 = arith.constant 0 : index
    %c0_241 = arith.constant 0 : index
    %207 = vector.load %arg2[%c7_239, %c0_240, %c0_241] : memref<9x8x4xbf16, #tpu.memory_space<vmem>>, vector<1x8x4xbf16>
    %208 = vector.shape_cast %207 : vector<1x8x4xbf16> to vector<8x4xbf16>
    %cst_242 = arith.constant dense<0.000000e+00> : vector<8x128xf32>
    %209 = tpu.matmul %208, %206, %cst_242 {dimension_numbers = #tpu.dot_dimension_numbers<[1], [0], [0], [1], [0, 0, 1, 1], [], []>} : vector<8x4xbf16>, vector<4x128xbf16>, vector<8x128xf32> -> vector<8x128xf32>
    %210 = arith.addf %204, %209 : vector<8x128xf32>
    %c0_243 = arith.constant 0 : index
    %c1_244 = arith.constant 1 : index
    %c0_245 = arith.constant 0 : index
    %c0_246 = arith.constant 0 : index
    %c9_247 = arith.constant 9 : index
    %211 = vector.load %arg1[%c0_243, %c1_244, %c0_245, %c0_246, %c9_247] : memref<1x2x2x4x256xbf16, #tpu.memory_space<vmem>>, vector<1x1x1x4x128xbf16>
    %212 = vector.shape_cast %211 : vector<1x1x1x4x128xbf16> to vector<4x128xbf16>
    %c8_248 = arith.constant 8 : index
    %c0_249 = arith.constant 0 : index
    %c0_250 = arith.constant 0 : index
    %213 = vector.load %arg2[%c8_248, %c0_249, %c0_250] : memref<9x8x4xbf16, #tpu.memory_space<vmem>>, vector<1x8x4xbf16>
    %214 = vector.shape_cast %213 : vector<1x8x4xbf16> to vector<8x4xbf16>
    %cst_251 = arith.constant dense<0.000000e+00> : vector<8x128xf32>
    %215 = tpu.matmul %214, %212, %cst_251 {dimension_numbers = #tpu.dot_dimension_numbers<[1], [0], [0], [1], [0, 0, 1, 1], [], []>} : vector<8x4xbf16>, vector<4x128xbf16>, vector<8x128xf32> -> vector<8x128xf32>
    %216 = arith.addf %210, %215 : vector<8x128xf32>
    %217 = vector.broadcast %23 : vector<1x128xf32> to vector<8x128xf32>
    %218 = arith.mulf %216, %217 : vector<8x128xf32>
    %219 = arith.truncf %218 : vector<8x128xf32> to vector<8x128xbf16>
    %c0_252 = arith.constant 0 : index
    %c2_253 = arith.constant 2 : index
    %c0_254 = arith.constant 0 : index
    %c0_255 = arith.constant 0 : index
    %220 = vector.load %arg3[%c0_252, %c2_253, %c0_254, %c0_255] : memref<1x4x8x128xbf16, #tpu.memory_space<vmem>>, vector<1x1x8x128xbf16>
    %221 = vector.shape_cast %220 : vector<1x1x8x128xbf16> to vector<8x128xbf16>
    %222 = vector.shape_cast %219 : vector<8x128xbf16> to vector<1x1x8x128xbf16>
    tpu.vector_store %arg3[%c0_252, %c2_253, %c0_254, %c0_255], %222 {strides = array<i32>} : memref<1x4x8x128xbf16, #tpu.memory_space<vmem>>, vector<1x1x8x128xbf16>,
    %cst_256 = arith.constant dense<0.000000e+00> : vector<8xf32>
    %223 = vector.multi_reduction <add>, %218, %cst_256 [1] : vector<8x128xf32> to vector<8xf32>
    %224 = vector.shape_cast %223 : vector<8xf32> to vector<8x1xf32>
    %225 = arith.addf %157, %224 : vector<8x1xf32>
    %226 = arith.mulf %218, %218 : vector<8x128xf32>
    %cst_257 = arith.constant dense<0.000000e+00> : vector<8xf32>
    %227 = vector.multi_reduction <add>, %226, %cst_257 [1] : vector<8x128xf32> to vector<8xf32>
    %228 = vector.shape_cast %227 : vector<8xf32> to vector<8x1xf32>
    %229 = arith.addf %161, %228 : vector<8x1xf32>
    %cst_258 = arith.constant 0.000000e+00 : f32
    %230 = vector.broadcast %cst_258 : f32 to vector<8x128xf32>
    %c0_259 = arith.constant 0 : index
    %c1_260 = arith.constant 1 : index
    %c1_261 = arith.constant 1 : index
    %c0_262 = arith.constant 0 : index
    %c0_263 = arith.constant 0 : index
    %231 = vector.load %arg1[%c0_259, %c1_260, %c1_261, %c0_262, %c0_263] : memref<1x2x2x4x256xbf16, #tpu.memory_space<vmem>>, vector<1x1x1x4x128xbf16>
    %232 = vector.shape_cast %231 : vector<1x1x1x4x128xbf16> to vector<4x128xbf16>
    %c0_264 = arith.constant 0 : index
    %c0_265 = arith.constant 0 : index
    %c0_266 = arith.constant 0 : index
    %233 = vector.load %arg2[%c0_264, %c0_265, %c0_266] : memref<9x8x4xbf16, #tpu.memory_space<vmem>>, vector<1x8x4xbf16>
    %234 = vector.shape_cast %233 : vector<1x8x4xbf16> to vector<8x4xbf16>
    %cst_267 = arith.constant dense<0.000000e+00> : vector<8x128xf32>
    %235 = tpu.matmul %234, %232, %cst_267 {dimension_numbers = #tpu.dot_dimension_numbers<[1], [0], [0], [1], [0, 0, 1, 1], [], []>} : vector<8x4xbf16>, vector<4x128xbf16>, vector<8x128xf32> -> vector<8x128xf32>
    %236 = arith.addf %230, %235 : vector<8x128xf32>
    %c0_268 = arith.constant 0 : index
    %c1_269 = arith.constant 1 : index
    %c0_270 = arith.constant 0 : index
    %c0_271 = arith.constant 0 : index
    %c1_272 = arith.constant 1 : index
    %237 = vector.load %arg1[%c0_268, %c1_269, %c0_270, %c0_271, %c1_272] : memref<1x2x2x4x256xbf16, #tpu.memory_space<vmem>>, vector<1x1x1x4x128xbf16>
    %238 = vector.shape_cast %237 : vector<1x1x1x4x128xbf16> to vector<4x128xbf16>
    %c1_273 = arith.constant 1 : index
    %c0_274 = arith.constant 0 : index
    %c0_275 = arith.constant 0 : index
    %239 = vector.load %arg2[%c1_273, %c0_274, %c0_275] : memref<9x8x4xbf16, #tpu.memory_space<vmem>>, vector<1x8x4xbf16>
    %240 = vector.shape_cast %239 : vector<1x8x4xbf16> to vector<8x4xbf16>
    %cst_276 = arith.constant dense<0.000000e+00> : vector<8x128xf32>
    %241 = tpu.matmul %240, %238, %cst_276 {dimension_numbers = #tpu.dot_dimension_numbers<[1], [0], [0], [1], [0, 0, 1, 1], [], []>} : vector<8x4xbf16>, vector<4x128xbf16>, vector<8x128xf32> -> vector<8x128xf32>
    %242 = arith.addf %236, %241 : vector<8x128xf32>
    %c0_277 = arith.constant 0 : index
    %c1_278 = arith.constant 1 : index
    %c1_279 = arith.constant 1 : index
    %c0_280 = arith.constant 0 : index
    %c1_281 = arith.constant 1 : index
    %243 = vector.load %arg1[%c0_277, %c1_278, %c1_279, %c0_280, %c1_281] : memref<1x2x2x4x256xbf16, #tpu.memory_space<vmem>>, vector<1x1x1x4x128xbf16>
    %244 = vector.shape_cast %243 : vector<1x1x1x4x128xbf16> to vector<4x128xbf16>
    %c2_282 = arith.constant 2 : index
    %c0_283 = arith.constant 0 : index
    %c0_284 = arith.constant 0 : index
    %245 = vector.load %arg2[%c2_282, %c0_283, %c0_284] : memref<9x8x4xbf16, #tpu.memory_space<vmem>>, vector<1x8x4xbf16>
    %246 = vector.shape_cast %245 : vector<1x8x4xbf16> to vector<8x4xbf16>
    %cst_285 = arith.constant dense<0.000000e+00> : vector<8x128xf32>
    %247 = tpu.matmul %246, %244, %cst_285 {dimension_numbers = #tpu.dot_dimension_numbers<[1], [0], [0], [1], [0, 0, 1, 1], [], []>} : vector<8x4xbf16>, vector<4x128xbf16>, vector<8x128xf32> -> vector<8x128xf32>
    %248 = arith.addf %242, %247 : vector<8x128xf32>
    %c0_286 = arith.constant 0 : index
    %c0_287 = arith.constant 0 : index
    %c1_288 = arith.constant 1 : index
    %c0_289 = arith.constant 0 : index
    %c8_290 = arith.constant 8 : index
    %249 = vector.load %arg1[%c0_286, %c0_287, %c1_288, %c0_289, %c8_290] : memref<1x2x2x4x256xbf16, #tpu.memory_space<vmem>>, vector<1x1x1x4x128xbf16>
    %250 = vector.shape_cast %249 : vector<1x1x1x4x128xbf16> to vector<4x128xbf16>
    %c3_291 = arith.constant 3 : index
    %c0_292 = arith.constant 0 : index
    %c0_293 = arith.constant 0 : index
    %251 = vector.load %arg2[%c3_291, %c0_292, %c0_293] : memref<9x8x4xbf16, #tpu.memory_space<vmem>>, vector<1x8x4xbf16>
    %252 = vector.shape_cast %251 : vector<1x8x4xbf16> to vector<8x4xbf16>
    %cst_294 = arith.constant dense<0.000000e+00> : vector<8x128xf32>
    %253 = tpu.matmul %252, %250, %cst_294 {dimension_numbers = #tpu.dot_dimension_numbers<[1], [0], [0], [1], [0, 0, 1, 1], [], []>} : vector<8x4xbf16>, vector<4x128xbf16>, vector<8x128xf32> -> vector<8x128xf32>
    %254 = arith.addf %248, %253 : vector<8x128xf32>
    %c0_295 = arith.constant 0 : index
    %c0_296 = arith.constant 0 : index
    %c0_297 = arith.constant 0 : index
    %c0_298 = arith.constant 0 : index
    %c9_299 = arith.constant 9 : index
    %255 = vector.load %arg1[%c0_295, %c0_296, %c0_297, %c0_298, %c9_299] : memref<1x2x2x4x256xbf16, #tpu.memory_space<vmem>>, vector<1x1x1x4x128xbf16>
    %256 = vector.shape_cast %255 : vector<1x1x1x4x128xbf16> to vector<4x128xbf16>
    %c4_300 = arith.constant 4 : index
    %c0_301 = arith.constant 0 : index
    %c0_302 = arith.constant 0 : index
    %257 = vector.load %arg2[%c4_300, %c0_301, %c0_302] : memref<9x8x4xbf16, #tpu.memory_space<vmem>>, vector<1x8x4xbf16>
    %258 = vector.shape_cast %257 : vector<1x8x4xbf16> to vector<8x4xbf16>
    %cst_303 = arith.constant dense<0.000000e+00> : vector<8x128xf32>
    %259 = tpu.matmul %258, %256, %cst_303 {dimension_numbers = #tpu.dot_dimension_numbers<[1], [0], [0], [1], [0, 0, 1, 1], [], []>} : vector<8x4xbf16>, vector<4x128xbf16>, vector<8x128xf32> -> vector<8x128xf32>
    %260 = arith.addf %254, %259 : vector<8x128xf32>
    %c0_304 = arith.constant 0 : index
    %c0_305 = arith.constant 0 : index
    %c1_306 = arith.constant 1 : index
    %c0_307 = arith.constant 0 : index
    %c9_308 = arith.constant 9 : index
    %261 = vector.load %arg1[%c0_304, %c0_305, %c1_306, %c0_307, %c9_308] : memref<1x2x2x4x256xbf16, #tpu.memory_space<vmem>>, vector<1x1x1x4x128xbf16>
    %262 = vector.shape_cast %261 : vector<1x1x1x4x128xbf16> to vector<4x128xbf16>
    %c5_309 = arith.constant 5 : index
    %c0_310 = arith.constant 0 : index
    %c0_311 = arith.constant 0 : index
    %263 = vector.load %arg2[%c5_309, %c0_310, %c0_311] : memref<9x8x4xbf16, #tpu.memory_space<vmem>>, vector<1x8x4xbf16>
    %264 = vector.shape_cast %263 : vector<1x8x4xbf16> to vector<8x4xbf16>
    %cst_312 = arith.constant dense<0.000000e+00> : vector<8x128xf32>
    %265 = tpu.matmul %264, %262, %cst_312 {dimension_numbers = #tpu.dot_dimension_numbers<[1], [0], [0], [1], [0, 0, 1, 1], [], []>} : vector<8x4xbf16>, vector<4x128xbf16>, vector<8x128xf32> -> vector<8x128xf32>
    %266 = arith.addf %260, %265 : vector<8x128xf32>
    %c0_313 = arith.constant 0 : index
    %c1_314 = arith.constant 1 : index
    %c1_315 = arith.constant 1 : index
    %c0_316 = arith.constant 0 : index
    %c8_317 = arith.constant 8 : index
    %267 = vector.load %arg1[%c0_313, %c1_314, %c1_315, %c0_316, %c8_317] : memref<1x2x2x4x256xbf16, #tpu.memory_space<vmem>>, vector<1x1x1x4x128xbf16>
    %268 = vector.shape_cast %267 : vector<1x1x1x4x128xbf16> to vector<4x128xbf16>
    %c6_318 = arith.constant 6 : index
    %c0_319 = arith.constant 0 : index
    %c0_320 = arith.constant 0 : index
    %269 = vector.load %arg2[%c6_318, %c0_319, %c0_320] : memref<9x8x4xbf16, #tpu.memory_space<vmem>>, vector<1x8x4xbf16>
    %270 = vector.shape_cast %269 : vector<1x8x4xbf16> to vector<8x4xbf16>
    %cst_321 = arith.constant dense<0.000000e+00> : vector<8x128xf32>
    %271 = tpu.matmul %270, %268, %cst_321 {dimension_numbers = #tpu.dot_dimension_numbers<[1], [0], [0], [1], [0, 0, 1, 1], [], []>} : vector<8x4xbf16>, vector<4x128xbf16>, vector<8x128xf32> -> vector<8x128xf32>
    %272 = arith.addf %266, %271 : vector<8x128xf32>
    %c0_322 = arith.constant 0 : index
    %c1_323 = arith.constant 1 : index
    %c0_324 = arith.constant 0 : index
    %c0_325 = arith.constant 0 : index
    %c9_326 = arith.constant 9 : index
    %273 = vector.load %arg1[%c0_322, %c1_323, %c0_324, %c0_325, %c9_326] : memref<1x2x2x4x256xbf16, #tpu.memory_space<vmem>>, vector<1x1x1x4x128xbf16>
    %274 = vector.shape_cast %273 : vector<1x1x1x4x128xbf16> to vector<4x128xbf16>
    %c7_327 = arith.constant 7 : index
    %c0_328 = arith.constant 0 : index
    %c0_329 = arith.constant 0 : index
    %275 = vector.load %arg2[%c7_327, %c0_328, %c0_329] : memref<9x8x4xbf16, #tpu.memory_space<vmem>>, vector<1x8x4xbf16>
    %276 = vector.shape_cast %275 : vector<1x8x4xbf16> to vector<8x4xbf16>
    %cst_330 = arith.constant dense<0.000000e+00> : vector<8x128xf32>
    %277 = tpu.matmul %276, %274, %cst_330 {dimension_numbers = #tpu.dot_dimension_numbers<[1], [0], [0], [1], [0, 0, 1, 1], [], []>} : vector<8x4xbf16>, vector<4x128xbf16>, vector<8x128xf32> -> vector<8x128xf32>
    %278 = arith.addf %272, %277 : vector<8x128xf32>
    %c0_331 = arith.constant 0 : index
    %c1_332 = arith.constant 1 : index
    %c1_333 = arith.constant 1 : index
    %c0_334 = arith.constant 0 : index
    %c9_335 = arith.constant 9 : index
    %279 = vector.load %arg1[%c0_331, %c1_332, %c1_333, %c0_334, %c9_335] : memref<1x2x2x4x256xbf16, #tpu.memory_space<vmem>>, vector<1x1x1x4x128xbf16>
    %280 = vector.shape_cast %279 : vector<1x1x1x4x128xbf16> to vector<4x128xbf16>
    %c8_336 = arith.constant 8 : index
    %c0_337 = arith.constant 0 : index
    %c0_338 = arith.constant 0 : index
    %281 = vector.load %arg2[%c8_336, %c0_337, %c0_338] : memref<9x8x4xbf16, #tpu.memory_space<vmem>>, vector<1x8x4xbf16>
    %282 = vector.shape_cast %281 : vector<1x8x4xbf16> to vector<8x4xbf16>
    %cst_339 = arith.constant dense<0.000000e+00> : vector<8x128xf32>
    %283 = tpu.matmul %282, %280, %cst_339 {dimension_numbers = #tpu.dot_dimension_numbers<[1], [0], [0], [1], [0, 0, 1, 1], [], []>} : vector<8x4xbf16>, vector<4x128xbf16>, vector<8x128xf32> -> vector<8x128xf32>
    %284 = arith.addf %278, %283 : vector<8x128xf32>
    %285 = vector.broadcast %23 : vector<1x128xf32> to vector<8x128xf32>
    %286 = arith.mulf %284, %285 : vector<8x128xf32>
    %287 = arith.truncf %286 : vector<8x128xf32> to vector<8x128xbf16>
    %c0_340 = arith.constant 0 : index
    %c3_341 = arith.constant 3 : index
    %c0_342 = arith.constant 0 : index
    %c0_343 = arith.constant 0 : index
    %288 = vector.load %arg3[%c0_340, %c3_341, %c0_342, %c0_343] : memref<1x4x8x128xbf16, #tpu.memory_space<vmem>>, vector<1x1x8x128xbf16>
    %289 = vector.shape_cast %288 : vector<1x1x8x128xbf16> to vector<8x128xbf16>
    %290 = vector.shape_cast %287 : vector<8x128xbf16> to vector<1x1x8x128xbf16>
    tpu.vector_store %arg3[%c0_340, %c3_341, %c0_342, %c0_343], %290 {strides = array<i32>} : memref<1x4x8x128xbf16, #tpu.memory_space<vmem>>, vector<1x1x8x128xbf16>,
    %cst_344 = arith.constant dense<0.000000e+00> : vector<8xf32>
    %291 = vector.multi_reduction <add>, %286, %cst_344 [1] : vector<8x128xf32> to vector<8xf32>
    %292 = vector.shape_cast %291 : vector<8xf32> to vector<8x1xf32>
    %293 = arith.addf %225, %292 : vector<8x1xf32>
    %294 = arith.mulf %286, %286 : vector<8x128xf32>
    %cst_345 = arith.constant dense<0.000000e+00> : vector<8xf32>
    %295 = vector.multi_reduction <add>, %294, %cst_345 [1] : vector<8x128xf32> to vector<8xf32>
    %296 = vector.shape_cast %295 : vector<8xf32> to vector<8x1xf32>
    %297 = arith.addf %229, %296 : vector<8x1xf32>
    %c0_346 = arith.constant 0 : index
    %c0_347 = arith.constant 0 : index
    %c0_348 = arith.constant 0 : index
    %298 = vector.load %arg4[%c0_346, %c0_347, %c0_348] : memref<1x8x2xf32, #tpu.memory_space<vmem>>, vector<1x8x1xf32>
    %299 = vector.shape_cast %298 : vector<1x8x1xf32> to vector<8x1xf32>
    %300 = vector.shape_cast %293 : vector<8x1xf32> to vector<1x8x1xf32>
    tpu.vector_store %arg4[%c0_346, %c0_347, %c0_348], %300 {strides = array<i32>} : memref<1x8x2xf32, #tpu.memory_space<vmem>>, vector<1x8x1xf32>,
    %c0_349 = arith.constant 0 : index
    %c0_350 = arith.constant 0 : index
    %c1_351 = arith.constant 1 : index
    %301 = vector.load %arg4[%c0_349, %c0_350, %c1_351] : memref<1x8x2xf32, #tpu.memory_space<vmem>>, vector<1x8x1xf32>
    %302 = vector.shape_cast %301 : vector<1x8x1xf32> to vector<8x1xf32>
    %303 = vector.shape_cast %297 : vector<8x1xf32> to vector<1x8x1xf32>
    tpu.vector_store %arg4[%c0_349, %c0_350, %c1_351], %303 {strides = array<i32>} : memref<1x8x2xf32, #tpu.memory_space<vmem>>, vector<1x8x1xf32>,
    return
  }
  func.func @transform_0(%arg0: i32) -> (i32, i32, i32, i32, i32) {
    %c0_i32 = arith.constant 0 : i32
    %c0_i32_0 = arith.constant 0 : i32
    %c0_i32_1 = arith.constant 0 : i32
    %c0_i32_2 = arith.constant 0 : i32
    %c0_i32_3 = arith.constant 0 : i32
    return %arg0, %c0_i32, %c0_i32_0, %c0_i32_1, %c0_i32_2 : i32, i32, i32, i32, i32
  }
  func.func @transform_1(%arg0: i32) -> (i32, i32, i32) {
    %c0_i32 = arith.constant 0 : i32
    %c0_i32_0 = arith.constant 0 : i32
    %c0_i32_1 = arith.constant 0 : i32
    %c0_i32_2 = arith.constant 0 : i32
    return %c0_i32, %c0_i32_0, %c0_i32_1 : i32, i32, i32
  }
  func.func @transform_2(%arg0: i32) -> (i32, i32, i32, i32) {
    %c0_i32 = arith.constant 0 : i32
    %c0_i32_0 = arith.constant 0 : i32
    %c0_i32_1 = arith.constant 0 : i32
    %c0_i32_2 = arith.constant 0 : i32
    return %arg0, %c0_i32, %c0_i32_0, %c0_i32_1 : i32, i32, i32, i32
  }
  func.func @transform_3(%arg0: i32) -> (i32, i32, i32) {
    %c0_i32 = arith.constant 0 : i32
    %c0_i32_0 = arith.constant 0 : i32
    %c0_i32_1 = arith.constant 0 : i32
    return %arg0, %c0_i32, %c0_i32_0 : i32, i32, i32
  }
}

</mosaic_0001>

<bundles_post_ra>
// kernel: conv_block_forward.3
= control target key start
LH: loop header
LB: loop body
LE: loop exit
PB: predicated region body
PF: predicated region fallthrough
CT: control target
= control target key end

     0   :  { %s314_s12 = smov 0   ;;  %s337_s0 = inlined_call_operand.vmem [shape: bf16[2,4,8,128], index: 0, kind: input, shape index: {}]   ;;  %s338_s1 = inlined_call_operand.vmem [shape: f32[8,1], index: 1, kind: input, shape index: {}]   ;;  %s339_s2 = inlined_call_operand.vmem [shape: f32[8,1], index: 2, kind: input, shape index: {}]   ;;  %s340_s3 = inlined_call_operand.vmem [shape: f32[2,8,128], index: 3, kind: output, shape index: {}]  }
   0x1 LB: > { %s261_s13 = sadd.s32 4294967295, %s291_s12   ;;  %p265_p0 = scmp.ge.s32.totalorder %s291_s12, 1  ;;  %s291_s12 = sphi %s314_s12, %s13_s12  }
   0x2   : > { %p137_p1 = scmp.lt.s32.totalorder %s291_s12, 3 }
   0x4   : > { %p138_p2 = pnand %p265_p0, %p137_p1 }
   0x5   : > { %p160_p3 = scmp.lt.s32.totalorder (!%p138_p2), %s261_s13, 1 }
   0x6   : > { %141 = sbr.rel (%p138_p2) target bundleno = 147 (0x93), region = 32 }
   0xb   : > { %v169_v0 = vld [vmem:[%s338_s1] sm:$0xff]  ;;  %v293_v1 = vmov 0   ;;  %s342_s13 = smov (!%p160_p3, %s261_s13), 1 }
   0xc   : > { %284 = vset.pattern.permute.xlu0 %v293_v1  ;;  %v175_v2 = vld [vmem:[%s339_s2] sm:$0xff]  ;;  %s274_s18 = sshll.u32 %s342_s13, 4  ;;  %s268_s22 = sshll.u32 %s342_s13, 3 }
   0xd   : > { %172 = vperm.xlu0 %284, %v169_v0   ;;  %s164_s21 = scalar_lea.vmem %s337_s0, %s274_s18  ;;  %s168_s25 = scalar_lea.vmem %s340_s3, %s268_s22 }
   0xe   : > { %v181_v4 = vld [vmem:[%s164_s21] sm:$0xff]   ;;  %v270_v5 = vld [vmem:[%s164_s21 + $0x8] sm:$0xff]  }
   0xf   : > { %v182_v6 = vunpack.c.l.bf16 %v181_v4  ;;  %v188_v7 = vunpack.c.h.bf16 %v181_v4  ;;  %v195_v8 = vunpack.c.l.bf16 %v270_v5  ;;  %v202_v9 = vunpack.c.h.bf16 %v270_v5 }
  0x15   : > { %178 = vperm.xlu0 %284, %v175_v2  }
  0x7f   : > { %v173_v3 = vpop.permute.xlu0 %172 }
  0x80   : > { %v183_v10 = vmul.f32 %v182_v6, %v173_v3  ;;  %v189_v11 = vmul.f32 %v188_v7, %v173_v3  ;;  %v196_v12 = vmul.f32 %v195_v8, %v173_v3  ;;  %v203_v17 = vmul.f32 %v202_v9, %v173_v3 }
  0x87   : > { %v179_v13 = vpop.permute.xlu0 %178 }
  0x88   : > { %v184_v14 = vadd.f32 %v183_v10, %v179_v13  ;;  %v190_v15 = vadd.f32 %v189_v11, %v179_v13  ;;  %v197_v16 = vadd.f32 %v196_v12, %v179_v13  ;;  %v204_v20 = vadd.f32 %v203_v17, %v179_v13 }
  0x8a   : > { %v185_v18 = vmax.f32 %v184_v14, 0.0  ;;  %v191_v19 = vmax.f32 %v190_v15, 0.0  ;;  %v198_v22 = vmax.f32 %v197_v16, 0.0  ;;  %v205_v24 = vmax.f32 %v204_v20, 0.0 }
  0x8c   : > { %v192_v21 = vmax.f32 %v185_v18, %v191_v19 }
  0x8e   : > { %v199_v23 = vmax.f32 %v192_v21, %v198_v22 }
  0x90   : > { %v206_v25 = vmax.f32 %v199_v23, %v205_v24 }
  0x92   : > { %207 = vst [vmem:[%s168_s25] sm:$0xff] %v206_v25 }
  0x93 PF: > { %s13_s12 = sadd.s32 1, %s291_s12  }
  0x94   : > { %p10_p4 = scmp.ge.s32.totalorder %s13_s12, 4  }
  0x96   :  { %12 = sbr.rel (!%p10_p4) target bundleno = 1 (0x1), region = 65 }

// kernel: conv_block_forward.2
= control target key start
LH: loop header
LB: loop body
LE: loop exit
PB: predicated region body
PF: predicated region fallthrough
CT: control target
= control target key end

     0   :  { %s1589_s12 = smov 0   ;;  %s1928_s0 = inlined_call_operand.vmem [shape: bf16[2,2,2,4,256], index: 0, kind: input, shape index: {}]   ;;  %s1929_s1 = inlined_call_operand.vmem [shape: bf16[9,8,4], index: 1, kind: input, shape index: {}]   ;;  %s1930_s2 = inlined_call_operand.vmem [shape: bf16[2,4,8,128], index: 2, kind: output, shape index: {0}]   ;;  %s1931_s3 = inlined_call_operand.vmem [shape: f32[2,8,2], index: 3, kind: output, shape index: {1}]  }
   0x1 LB: > { %s1432_s13 = sadd.s32 4294967295, %s1563_s12   ;;  %p1436_p0 = scmp.ge.s32.totalorder %s1563_s12, 1  ;;  %s1563_s12 = sphi %s1589_s12, %s14_s12  }
   0x2   : > { %p140_p1 = scmp.lt.s32.totalorder %s1563_s12, 3 }
   0x4   : > { %p141_p2 = pnand %p1436_p0, %p140_p1 }
   0x5   : > { %p168_p3 = scmp.lt.s32.totalorder (!%p141_p2), %s1432_s13, 1  ;;  %s1565_s18 = smov (!%p141_p2), 127  }
   0x6   : > { %144 = sbr.rel (%p141_p2) target bundleno = 608 (0x260), region = 28  ;;  %s1566_s19 = smov (!%p141_p2), 120  }
   0x7   : > { %s1567_s20 = smov (!%p141_p2), 119  }
   0xb   : > { %s1933_s13 = smov (!%p168_p3, %s1432_s13), 1  ;;  %vm212_vm0 = vcmask 1041408   ;;  %v1444_v48 = vld [vmem:[%s1929_s1 + $0x4] sm:$0xf]  ;;  %vm208_vm1 = vcmask 31744   ;;  %vm261_vm2 = vcmask 1039360  }
   0xc   : > { %s1543_s14 = sshll.u32 %s1933_s13, 4  ;;  %v203_v51 = vld [vmem:[%s1929_s1] sm:$0xf]  ;;  %v1450_v55 = vld [vmem:[%s1929_s1 + $0xc] sm:$0xf]  ;;  %vm378_vm3 = vcmask 982016  }
   0xd   : > { %s1605_s17 = scalar_lea.vmem %s1928_s0, %s1543_s14  ;;  %vm447_vm4 = vcmask 973824   ;;  %s1878_s11 = scalar_lea.vmem %s1930_s2, %s1543_s14  ;;  %vm1342_vm8 = vcmask 7168   ;;  %vm1344_vm9 = vcmask 15368  }
   0xe   : > { %v248_v0 = vld [vmem:[%s1605_s17] sm:$0xf]  ;;  %v1455_v1 = vld [vmem:[%s1605_s17 + $0x8] sm:$0xf]  ;;  %v1460_v7 = vld [vmem:[%s1605_s17 + $0x4] sm:$0xf] }
   0xf   : > { %252 = vst [vmem:[#allocation1] ss:$4 sm:$0xff] %v248_v0  ;;  %v365_v4 = vld [vmem:[%s1605_s17] sm:$0xf]  ;;  %v1469_v16 = vld [vmem:[%s1605_s17 + $0x4] sm:$0xf] }
  0x10   : > { %v434_v10 = vld [vmem:[%s1605_s17] sm:$0xf]  ;;  %v1475_v19 = vld [vmem:[%s1605_s17 + $0x8] sm:$0xf]  ;;  %v1478_v22 = vld [vmem:[%s1605_s17 + $0xc] sm:$0xf] }
  0x11   : > { %v481_v13 = vld [vmem:[%s1605_s17] sm:$0xf]  ;;  %v1481_v25 = vld [vmem:[%s1605_s17 + $0x4] sm:$0xf]  ;;  %v1495_v34 = vld [vmem:[%s1605_s17 + $0x8] sm:$0xf] }
  0x12   : > { %v686_v28 = vld [vmem:[%s1605_s17] sm:$0xf]  ;;  %v1486_v31 = vld [vmem:[%s1605_s17 + $0x4] sm:$0xf]  ;;  %v1449_v52 = vld [vmem:[%s1605_s17 + $0x8] sm:$0x3] }
  0x13   : > { %v838_v37 = vld [vmem:[%s1605_s17] sm:$0xf]  ;;  %v1500_v40 = vld [vmem:[%s1605_s17 + $0x4] sm:$0xf]  ;;  %v291_v53 = vsel %vm212_vm0, %v1449_v52, 0  ;;  %s1441_s27 = sshll.u32 %s1933_s13, 3 }
  0x14   : > { %v1443_v43 = vld [vmem:[%s1605_s17 + $0x4] sm:$0x3]  ;;  %v202_v45 = vld [vmem:[%s1605_s17] sm:$0x3]  ;;  %300 = vmatpush.bf16.msra.mxu3 %v291_v53  ;;  %v1505_v57 = vld [vmem:[%s1605_s17 + $0x8] sm:$0xf]  ;;  %s181_s30 = scalar_lea.vmem %s1931_s3, %s1441_s27 }
  0x15   : > { %v214_v44 = vsel %vm212_vm0, %v1443_v43, 0  ;;  %v233_v46 = vsel %vm212_vm0, %v202_v45, 0  ;;  %v904_v47 = vld [vmem:[%s1605_s17] sm:$0xf]  ;;  %v1452_v60 = vld [vmem:[%s1605_s17 + $0xc] sm:$0x3] }
  0x16   : > { %v253_v2 = vld.sshfl [vmem:[#allocation1] sm:$0xff pattern:$0x73625140]  ;;  %v255_v3 = vld.sshfl [vmem:[#allocation1 + $0x8] sm:$0xff pattern:$0x73625140]  ;;  %223 = vmatpush.bf16.msra.mxu0 %v214_v44  ;;  %242 = vmatpush.bf16.msra.mxu1 %v233_v46 }
  0x17   : > { %257 = vrot.lane.b32.xlu0 %v253_v2, %s1565_s18  ;;  %335 = vst [vmem:[#allocation1] ss:$4 sm:$0xff] %v1455_v1  ;;  %1451 = vmatmul.msk.bf16.vlgmr.msra.gmra.mxu3 %vm208_vm1, %v1450_v55  ;;  %v315_v61 = vsel %vm212_vm0, %v1452_v60, 0  ;;  %v1508_v2 = vld [vmem:[%s1605_s17 + $0xc] sm:$0xf] }
  0x18   : > { %v1466_v43 = vld [vmem:[%s1929_s1 + $0x4] sm:$0xf]  ;;  %v480_v44 = vld [vmem:[%s1929_s1] sm:$0xf]  ;;  %v1470_v52 = vld [vmem:[%s1929_s1 + $0x8] sm:$0xf] }
  0x19   : > { %1445 = vmatmul.msk.bf16.vlgmr.msra.gmra.mxu0 %vm208_vm1, %v1444_v48  ;;  %1446 = vmatmul.msk.bf16.vlgmr.msra.gmra.mxu1 %vm208_vm1, %v203_v51  ;;  %v1166_v51 = vld [vmem:[%s1605_s17] sm:$0xf]  ;;  %v1473_v53 = vld [vmem:[%s1929_s1 + $0xc] sm:$0xf] }
  0x1a   : > { %324 = vmatpush.bf16.msrb.mxu0 %v315_v61  ;;  %v1528_v61 = vld [vmem:[%s1605_s17 + $0x4] sm:$0xf] }
  0x1e   : > { %v338_v5 = vld.sshfl [vmem:[#allocation1 + $0x8] sm:$0xff pattern:$0x73625140]  ;;  %v336_v6 = vld.sshfl [vmem:[#allocation1] sm:$0xff pattern:$0x73625140] }
  0x1f   : > { %259 = vrot.lane.b32.xlu0 %v255_v3, %s1565_s18  ;;  %342 = vrot.lane.b32.xlu1 %v338_v5, %s1565_s18  ;;  %369 = vst [vmem:[#allocation1] ss:$4 sm:$0xff] %v365_v4  ;;  %v1453_v3 = vld [vmem:[%s1929_s1 + $0x10] sm:$0xf]  ;;  %v1447_v4 = vld [vmem:[%s1929_s1 + $0x8] sm:$0xf] }
  0x26   : > { %v370_v8 = vld.sshfl [vmem:[#allocation1] sm:$0xff pattern:$0x73625140]  ;;  %v372_v9 = vld.sshfl [vmem:[#allocation1 + $0x8] sm:$0xff pattern:$0x73625140] }
  0x27   : > { %374 = vrot.lane.b32.xlu1 %v370_v8, %s1566_s19  ;;  %340 = vrot.lane.b32.xlu0 %v336_v6, %s1565_s18  ;;  %404 = vst [vmem:[#allocation1] ss:$4 sm:$0xff] %v1460_v7 }
  0x29   : > { %1454 = vmatmul.msk.bf16.vlgmr.msrb.gmra.mxu0 %vm208_vm1, %v1453_v3 }
  0x2e   : > { %v405_v11 = vld.sshfl [vmem:[#allocation1] sm:$0xff pattern:$0x73625140]  ;;  %v407_v12 = vld.sshfl [vmem:[#allocation1 + $0x8] sm:$0xff pattern:$0x73625140] }
  0x2f   : > { %376 = vrot.lane.b32.xlu1 %v372_v9, %s1566_s19  ;;  %438 = vst [vmem:[#allocation1] ss:$4 sm:$0xff] %v434_v10  ;;  %409 = vrot.lane.b32.xlu2 %v405_v11, %s1566_s19 }
  0x36   : > { %v441_v14 = vld.sshfl [vmem:[#allocation1 + $0x8] sm:$0xff pattern:$0x73625140]  ;;  %v439_v15 = vld.sshfl [vmem:[#allocation1] sm:$0xff pattern:$0x73625140] }
  0x37   : > { %445 = vrot.lane.b32.xlu0 %v441_v14, %s1567_s20  ;;  %484 = vst [vmem:[#allocation1] ss:$4 sm:$0xff] %v481_v13  ;;  %411 = vrot.lane.b32.xlu2 %v407_v12, %s1566_s19  ;;  %v1511_v14 = vld [vmem:[%s1605_s17 + $0x8] sm:$0xf] }
  0x3e   : > { %v487_v17 = vld.sshfl [vmem:[#allocation1 + $0x8] sm:$0xff pattern:$0x73625140]  ;;  %v485_v18 = vld.sshfl [vmem:[#allocation1] sm:$0xff pattern:$0x73625140] }
  0x3f   : > { %491 = vrot.lane.b32.xlu1 %v487_v17, %s1565_s18  ;;  %489 = vrot.lane.b32.xlu0 %v485_v18, %s1565_s18  ;;  %535 = vst [vmem:[#allocation1] ss:$4 sm:$0xff] %v1469_v16  ;;  %v1456_v16 = vld [vmem:[%s1929_s1 + $0x14] sm:$0xf] }
  0x40   : > { %443 = vrot.lane.b32.xlu2 %v439_v15, %s1567_s20  ;;  %v1461_v15 = vld [vmem:[%s1929_s1 + $0x1c] sm:$0xf] }
  0x46   : > { %v536_v20 = vld.sshfl [vmem:[#allocation1] sm:$0xff pattern:$0x73625140]  ;;  %v538_v21 = vld.sshfl [vmem:[#allocation1 + $0x8] sm:$0xff pattern:$0x73625140] }
  0x47   : > { %540 = vrot.lane.b32.xlu1 %v536_v20, %s1565_s18  ;;  %590 = vst [vmem:[#allocation1] ss:$4 sm:$0xff] %v1475_v19 }
  0x48   : > { %542 = vrot.lane.b32.xlu2 %v538_v21, %s1565_s18 }
  0x4e   : > { %v591_v23 = vld.sshfl [vmem:[#allocation1] sm:$0xff pattern:$0x73625140]  ;;  %v593_v24 = vld.sshfl [vmem:[#allocation1 + $0x8] sm:$0xff pattern:$0x73625140] }
  0x4f   : > { %595 = vrot.lane.b32.xlu0 %v591_v23, %s1565_s18  ;;  %597 = vrot.lane.b32.xlu1 %v593_v24, %s1565_s18  ;;  %623 = vst [vmem:[#allocation1] ss:$4 sm:$0xff] %v1478_v22  ;;  %v1516_v22 = vld [vmem:[%s1605_s17 + $0x8] sm:$0xf]  ;;  %v1458_v23 = vld [vmem:[%s1929_s1 + $0x18] sm:$0xf] }
  0x56   : > { %v626_v26 = vld.sshfl [vmem:[#allocation1 + $0x8] sm:$0xff pattern:$0x73625140]  ;;  %v624_v27 = vld.sshfl [vmem:[#allocation1] sm:$0xff pattern:$0x73625140] }
  0x57   : > { %630 = vrot.lane.b32.xlu0 %v626_v26, %s1565_s18  ;;  %656 = vst [vmem:[#allocation1] ss:$4 sm:$0xff] %v1481_v25  ;;  %628 = vrot.lane.b32.xlu2 %v624_v27, %s1565_s18  ;;  %v1465_v26 = vld [vmem:[%s1605_s17 + $0x4] sm:$0x3] }
  0x58   : > { %v517_v27 = vsel %vm212_vm0, %v1465_v26, 0  ;;  %v1492_v26 = vld [vmem:[%s1929_s1 + $0x4] sm:$0xf] }
  0x5e   : > { %v657_v29 = vld.sshfl [vmem:[#allocation1] sm:$0xff pattern:$0x73625140]  ;;  %v659_v30 = vld.sshfl [vmem:[#allocation1 + $0x8] sm:$0xff pattern:$0x73625140] }
  0x5f   : > { %661 = vrot.lane.b32.xlu1 %v657_v29, %s1566_s19  ;;  %689 = vst [vmem:[#allocation1] ss:$4 sm:$0xff] %v686_v28  ;;  %663 = vrot.lane.b32.xlu2 %v659_v30, %s1566_s19 }
  0x66   : > { %v692_v32 = vld.sshfl [vmem:[#allocation1 + $0x8] sm:$0xff pattern:$0x73625140]  ;;  %v690_v33 = vld.sshfl [vmem:[#allocation1] sm:$0xff pattern:$0x73625140] }
  0x67   : > { %696 = vrot.lane.b32.xlu0 %v692_v32, %s1567_s20  ;;  %722 = vst [vmem:[#allocation1] ss:$4 sm:$0xff] %v1486_v31  ;;  %694 = vrot.lane.b32.xlu2 %v690_v33, %s1567_s20  ;;  %v1520_v32 = vld [vmem:[%s1605_s17 + $0xc] sm:$0xf]  ;;  %v1463_v33 = vld [vmem:[%s1929_s1 + $0x20] sm:$0xf] }
  0x6e   : > { %v723_v35 = vld.sshfl [vmem:[#allocation1] sm:$0xff pattern:$0x73625140]  ;;  %v725_v36 = vld.sshfl [vmem:[#allocation1 + $0x8] sm:$0xff pattern:$0x73625140] }
  0x6f   : > { %727 = vrot.lane.b32.xlu1 %v723_v35, %s1567_s20  ;;  %808 = vst [vmem:[#allocation1] ss:$4 sm:$0xff] %v1495_v34  ;;  %729 = vrot.lane.b32.xlu2 %v725_v36, %s1567_s20  ;;  %v1472_v36 = vld [vmem:[%s1605_s17 + $0xc] sm:$0x3] }
  0x76   : > { %v811_v38 = vld.sshfl [vmem:[#allocation1 + $0x8] sm:$0xff pattern:$0x73625140]  ;;  %v809_v39 = vld.sshfl [vmem:[#allocation1] sm:$0xff pattern:$0x73625140] }
  0x77   : > { %815 = vrot.lane.b32.xlu0 %v811_v38, %s1565_s18  ;;  %841 = vst [vmem:[#allocation1] ss:$4 sm:$0xff] %v838_v37  ;;  %813 = vrot.lane.b32.xlu2 %v809_v39, %s1565_s18  ;;  %v571_v39 = vsel %vm212_vm0, %v1472_v36, 0 }
  0x7e   : > { %v844_v41 = vld.sshfl [vmem:[#allocation1 + $0x8] sm:$0xff pattern:$0x73625140]  ;;  %v842_v42 = vld.sshfl [vmem:[#allocation1] sm:$0xff pattern:$0x73625140] }
  0x7f   : > { %848 = vrot.lane.b32.xlu1 %v844_v41, %s1566_s19  ;;  %846 = vrot.lane.b32.xlu0 %v842_v42, %s1566_s19  ;;  %874 = vst [vmem:[#allocation1] ss:$4 sm:$0xff] %v1500_v40  ;;  %v1523_v42 = vld [vmem:[%s1605_s17 + $0x4] sm:$0xf] }
  0x86   : > { %v877_v49 = vld.sshfl [vmem:[#allocation1 + $0x8] sm:$0xff pattern:$0x73625140]  ;;  %v875_v50 = vld.sshfl [vmem:[#allocation1] sm:$0xff pattern:$0x73625140] }
  0x87   : > { %881 = vrot.lane.b32.xlu1 %v877_v49, %s1566_s19  ;;  %879 = vrot.lane.b32.xlu0 %v875_v50, %s1566_s19  ;;  %907 = vst [vmem:[#allocation1] ss:$4 sm:$0xff] %v904_v47 }
  0x89   : > { %v258_v54 = vpop.permute.xlu0 %257  ;;  %v410_v56 = vpop.permute.xlu2 %409 }
  0x8e   : > { %v908_v58 = vld.sshfl [vmem:[#allocation1] sm:$0xff pattern:$0x73625140]  ;;  %v910_v59 = vld.sshfl [vmem:[#allocation1 + $0x8] sm:$0xff pattern:$0x73625140] }
  0x8f   : > { %940 = vst [vmem:[#allocation1] ss:$4 sm:$0xff] %v1505_v57  ;;  %912 = vrot.lane.b32.xlu1 %v908_v58, %s1567_s20  ;;  %914 = vrot.lane.b32.xlu2 %v910_v59, %s1567_s20 }
  0x91   : > { %v260_v62 = vpop.permute.xlu0 %259  ;;  %v343_v63 = vpop.permute.xlu1 %342 }
  0x92   : > { %v262_v0 = vsel %vm261_vm2, %v258_v54, %v260_v62  ;;  %v412_v5 = vpop.permute.xlu2 %411  ;;  %v1476_v62 = vld [vmem:[%s1929_s1 + $0x10] sm:$0xf] }
  0x93   : > { %v267_v1 = vsel %vm212_vm0, %v262_v0, 0  ;;  %v413_v8 = vsel %vm378_vm3, %v410_v56, %v412_v5  ;;  %v1491_v5 = vld [vmem:[%s1605_s17 + $0xc] sm:$0x3] }
  0x94   : > { %276 = vmatpush.bf16.msra.mxu2 %v267_v1  ;;  %v418_v9 = vsel %vm212_vm0, %v413_v8, 0  ;;  %v1479_v8 = vld [vmem:[%s1929_s1 + $0x14] sm:$0xf] }
  0x95   : > { %427 = vmatpush.bf16.msrb.mxu3 %v418_v9 }
  0x96   : > { %v941_v6 = vld.sshfl [vmem:[#allocation1] sm:$0xff pattern:$0x73625140]  ;;  %v943_v7 = vld.sshfl [vmem:[#allocation1 + $0x8] sm:$0xff pattern:$0x73625140] }
  0x97   : > { %973 = vst [vmem:[#allocation1] ss:$4 sm:$0xff] %v1508_v2  ;;  %945 = vrot.lane.b32.xlu1 %v941_v6, %s1566_s19  ;;  %947 = vrot.lane.b32.xlu2 %v943_v7, %s1566_s19  ;;  %v1531_v6 = vld [vmem:[%s1605_s17 + $0xc] sm:$0xf]  ;;  %v771_v7 = vsel %vm212_vm0, %v1491_v5, 0 }
  0x98   : > { %1448 = vmatmul.msk.bf16.vlgmr.msra.gmra.mxu2 %vm208_vm1, %v1447_v4  ;;  %1462 = vmatmul.msk.bf16.vlgmr.msrb.gmra.mxu3 %vm208_vm1, %v1461_v15  ;;  %v1534_v15 = vld [vmem:[%s1605_s17 + $0x8] sm:$0xf] }
  0x99   : > { %v375_v10 = vpop.permute.xlu1 %374  ;;  %v341_v11 = vpop.permute.xlu0 %340 }
  0x9a   : > { %v344_v12 = vsel %vm261_vm2, %v341_v11, %v343_v63  ;;  %v444_v29 = vpop.permute.xlu2 %443 }
  0x9b   : > { %v349_v13 = vsel %vm212_vm0, %v344_v12, 0 }
  0x9c   : > { %358 = vmatpush.bf16.msrb.mxu1 %v349_v13 }
  0x9e   : > { %v976_v17 = vld.sshfl [vmem:[#allocation1 + $0x8] sm:$0xff pattern:$0x73625140]  ;;  %v974_v18 = vld.sshfl [vmem:[#allocation1] sm:$0xff pattern:$0x73625140] }
  0x9f   : > { %980 = vrot.lane.b32.xlu0 %v976_v17, %s1566_s19  ;;  %1006 = vst [vmem:[#allocation1] ss:$4 sm:$0xff] %v1511_v14  ;;  %978 = vrot.lane.b32.xlu2 %v974_v18, %s1566_s19  ;;  %v1490_v14 = vld [vmem:[%s1605_s17 + $0x8] sm:$0x3] }
  0xa0   : > { %1457 = vmatmul.msk.bf16.vlgmr.msrb.gmra.mxu1 %vm208_vm1, %v1456_v16  ;;  %v1482_v16 = vld [vmem:[%s1929_s1 + $0x18] sm:$0xf]  ;;  %v790_v17 = vsel %vm212_vm0, %v1490_v14, 0 }
  0xa1   : > { %v377_v19 = vpop.permute.xlu1 %376 }
  0xa2   : > { %v379_v20 = vsel %vm378_vm3, %v375_v10, %v377_v19  ;;  %v543_v47 = vpop.permute.xlu2 %542 }
  0xa3   : > { %v384_v21 = vsel %vm212_vm0, %v379_v20, 0 }
  0xa4   : > { %393 = vmatpush.bf16.msrb.mxu2 %v384_v21 }
  0xa6   : > { %v1009_v24 = vld.sshfl [vmem:[#allocation1 + $0x8] sm:$0xff pattern:$0x73625140]  ;;  %v1007_v25 = vld.sshfl [vmem:[#allocation1] sm:$0xff pattern:$0x73625140] }
  0xa7   : > { %1013 = vrot.lane.b32.xlu0 %v1009_v24, %s1567_s20  ;;  %1011 = vrot.lane.b32.xlu2 %v1007_v25, %s1567_s20  ;;  %1052 = vst [vmem:[#allocation1] ss:$4 sm:$0xff] %v1516_v22  ;;  %v1537_v24 = vld [vmem:[%s1605_s17 + $0xc] sm:$0xf]  ;;  %v1484_v25 = vld [vmem:[%s1929_s1 + $0x1c] sm:$0xf] }
  0xa8   : > { %1459 = vmatmul.msk.bf16.vlgmr.msrb.gmra.mxu2 %vm208_vm1, %v1458_v23 }
  0xa9   : > { %v446_v28 = vpop.permute.xlu0 %445  ;;  %526 = vmatpush.bf16.msra.mxu2 %v517_v27 }
  0xaa   : > { %v448_v30 = vsel %vm447_vm4, %v444_v29, %v446_v28 }
  0xab   : > { %v453_v31 = vsel %vm212_vm0, %v448_v30, 0 }
  0xac   : > { %462 = vmatpush.bf16.msra.mxu0 %v453_v31 }
  0xae   : > { %v1055_v34 = vld.sshfl [vmem:[#allocation1 + $0x8] sm:$0xff pattern:$0x73625140]  ;;  %v1053_v35 = vld.sshfl [vmem:[#allocation1] sm:$0xff pattern:$0x73625140] }
  0xaf   : > { %1059 = vrot.lane.b32.xlu1 %v1055_v34, %s1565_s18  ;;  %1057 = vrot.lane.b32.xlu0 %v1053_v35, %s1565_s18  ;;  %1103 = vst [vmem:[#allocation1] ss:$4 sm:$0xff] %v1520_v32  ;;  %v764_v34 = vld [vmem:[%s1929_s1] sm:$0xf] }
  0xb0   : > { %1464 = vmatmul.msk.bf16.vlgmr.msra.gmra.mxu0 %vm208_vm1, %v1463_v33  ;;  %v1487_v33 = vld [vmem:[%s1929_s1 + $0x20] sm:$0xf] }
  0xb1   : > { %v492_v37 = vpop.permute.xlu1 %491  ;;  %v490_v38 = vpop.permute.xlu0 %489  ;;  %580 = vmatpush.bf16.msrb.mxu0 %v571_v39 }
  0xb2   : > { %v493_v40 = vsel %vm261_vm2, %v490_v38, %v492_v37  ;;  %v629_v56 = vpop.permute.xlu2 %628 }
  0xb3   : > { %v498_v41 = vsel %vm212_vm0, %v493_v40, 0 }
  0xb4   : > { %507 = vmatpush.bf16.msra.mxu1 %v498_v41 }
  0xb6   : > { %v1104_v45 = vld.sshfl [vmem:[#allocation1] sm:$0xff pattern:$0x73625140]  ;;  %v1106_v46 = vld.sshfl [vmem:[#allocation1 + $0x8] sm:$0xff pattern:$0x73625140] }
  0xb7   : > { %1136 = vst [vmem:[#allocation1] ss:$4 sm:$0xff] %v1523_v42  ;;  %1110 = vrot.lane.b32.xlu0 %v1106_v46, %s1565_s18  ;;  %1467 = vmatmul.msk.bf16.vlgmr.msra.gmra.mxu1 %vm208_vm1, %v1466_v43  ;;  %v1496_v43 = vld [vmem:[%s1929_s1 + $0x8] sm:$0xf]  ;;  %v1498_v46 = vld [vmem:[%s1929_s1 + $0xc] sm:$0xf] }
  0xb8   : > { %1468 = vmatmul.msk.bf16.vlgmr.msra.gmra.mxu2 %vm208_vm1, %v480_v44  ;;  %1108 = vrot.lane.b32.xlu2 %v1104_v45, %s1565_s18 }
  0xb9   : > { %v541_v48 = vpop.permute.xlu1 %540 }
  0xba   : > { %v544_v49 = vsel %vm261_vm2, %v541_v48, %v543_v47  ;;  %v664_v3 = vpop.permute.xlu2 %663 }
  0xbb   : > { %v549_v50 = vsel %vm212_vm0, %v544_v49, 0 }
  0xbc   : > { %558 = vmatpush.bf16.msra.mxu3 %v549_v50 }
  0xbe   : > { %v1137_v54 = vld.sshfl [vmem:[#allocation1] sm:$0xff pattern:$0x73625140]  ;;  %v1139_v55 = vld.sshfl [vmem:[#allocation1 + $0x8] sm:$0xff pattern:$0x73625140] }
  0xbf   : > { %1141 = vrot.lane.b32.xlu1 %v1137_v54, %s1566_s19  ;;  %1169 = vst [vmem:[#allocation1] ss:$4 sm:$0xff] %v1166_v51  ;;  %1471 = vmatmul.msk.bf16.vlgmr.msra.gmra.mxu3 %vm208_vm1, %v1470_v52  ;;  %v1501_v52 = vld [vmem:[%s1929_s1 + $0x10] sm:$0xf] }
  0xc0   : > { %1143 = vrot.lane.b32.xlu2 %v1139_v55, %s1566_s19  ;;  %1474 = vmatmul.msk.bf16.vlgmr.msrb.gmra.mxu0 %vm208_vm1, %v1473_v53  ;;  %v225_v55 = vpop.f32.mrf.mxu0 }
  0xc1   : > { %v596_v57 = vpop.permute.xlu0 %595  ;;  %v598_v58 = vpop.permute.xlu1 %597 }
  0xc2   : > { %v599_v59 = vsel %vm261_vm2, %v596_v57, %v598_v58  ;;  %v695_v18 = vpop.permute.xlu2 %694  ;;  %v1503_v58 = vld [vmem:[%s1929_s1 + $0x14] sm:$0xf] }
  0xc3   : > { %v604_v60 = vsel %vm212_vm0, %v599_v59, 0  ;;  %v244_v59 = vpop.f32.mrf.mxu1 }
  0xc4   : > { %613 = vmatpush.bf16.msrb.mxu1 %v604_v60 }
  0xc6   : > { %v1172_v63 = vld.sshfl [vmem:[#allocation1 + $0x8] sm:$0xff pattern:$0x73625140]  ;;  %v1170_v0 = vld.sshfl [vmem:[#allocation1] sm:$0xff pattern:$0x73625140] }
  0xc7   : > { %1176 = vrot.lane.b32.xlu1 %v1172_v63, %s1567_s20  ;;  %1174 = vrot.lane.b32.xlu0 %v1170_v0, %s1567_s20  ;;  %1202 = vst [vmem:[#allocation1] ss:$4 sm:$0xff] %v1528_v61  ;;  %v1506_v0 = vld [vmem:[%s1929_s1 + $0x18] sm:$0xf] }
  0xc8   : > { %1477 = vmatmul.msk.bf16.vlgmr.msrb.gmra.mxu1 %vm208_vm1, %v1476_v62  ;;  %v227_v62 = vpop.f32.mrf.mxu0 }
  0xc9   : > { %v631_v1 = vpop.permute.xlu0 %630 }
  0xca   : > { %v632_v2 = vsel %vm261_vm2, %v629_v56, %v631_v1  ;;  %v730_v29 = vpop.permute.xlu2 %729 }
  0xcb   : > { %v637_v4 = vsel %vm212_vm0, %v632_v2, 0  ;;  %v246_v2 = vpop.f32.mrf.mxu1 }
  0xcc   : > { %646 = vmatpush.bf16.msrb.mxu2 %v637_v4  ;;  %v302_v4 = vpop.f32.mrf.mxu3 }
  0xce   : > { %v1205_v9 = vld.sshfl [vmem:[#allocation1 + $0x8] sm:$0xff pattern:$0x73625140]  ;;  %v1203_v10 = vld.sshfl [vmem:[#allocation1] sm:$0xff pattern:$0x73625140] }
  0xcf   : > { %1209 = vrot.lane.b32.xlu1 %v1205_v9, %s1567_s20  ;;  %1207 = vrot.lane.b32.xlu0 %v1203_v10, %s1567_s20  ;;  %1235 = vst [vmem:[#allocation1] ss:$4 sm:$0xff] %v1531_v6  ;;  %v245_v10 = vadd.f32 %v244_v59, %v225_v55 }
  0xd0   : > { %780 = vmatpush.bf16.msra.mxu2 %v771_v7  ;;  %v326_v7 = vpop.f32.mrf.mxu0 }
  0xd1   : > { %1480 = vmatmul.msk.bf16.vlgmr.msrb.gmra.mxu2 %vm208_vm1, %v1479_v8  ;;  %v662_v11 = vpop.permute.xlu1 %661  ;;  %v1509_v8 = vld [vmem:[%s1929_s1 + $0x1c] sm:$0xf] }
  0xd2   : > { %v665_v12 = vsel %vm378_vm3, %v662_v11, %v664_v3  ;;  %v814_v38 = vpop.permute.xlu2 %813 }
  0xd3   : > { %v670_v13 = vsel %vm212_vm0, %v665_v12, 0 }
  0xd4   : > { %679 = vmatpush.bf16.msrb.mxu3 %v670_v13  ;;  %v304_v12 = vpop.f32.mrf.mxu3  ;;  %v1515_v13 = vld [vmem:[%s1605_s17 + $0xc] sm:$0x3] }
  0xd6   : > { %v1236_v19 = vld.sshfl [vmem:[#allocation1] sm:$0xff pattern:$0x73625140]  ;;  %v1238_v20 = vld.sshfl [vmem:[#allocation1 + $0x8] sm:$0xff pattern:$0x73625140] }
  0xd7   : > { %1268 = vst [vmem:[#allocation1] ss:$4 sm:$0xff] %v1534_v15  ;;  %1483 = vmatmul.msk.bf16.vlgmr.msrb.gmra.mxu3 %vm208_vm1, %v1482_v16  ;;  %v1085_v15 = vsel %vm212_vm0, %v1515_v13, 0 }
  0xd8   : > { %799 = vmatpush.bf16.msra.mxu3 %v790_v17 }
  0xd9   : > { %v697_v21 = vpop.permute.xlu0 %696 }
  0xda   : > { %v698_v22 = vsel %vm447_vm4, %v695_v18, %v697_v21  ;;  %v328_v18 = vpop.f32.mrf.mxu0 }
  0xdb   : > { %v703_v23 = vsel %vm212_vm0, %v698_v22, 0  ;;  %v1048_v22 = vld [vmem:[%s1929_s1] sm:$0xf] }
  0xdc   : > { %712 = vmatpush.bf16.msra.mxu0 %v703_v23 }
  0xde   : > { %v1269_v27 = vld.sshfl [vmem:[#allocation1] sm:$0xff pattern:$0x73625140]  ;;  %v1271_v28 = vld.sshfl [vmem:[#allocation1 + $0x8] sm:$0xff pattern:$0x73625140] }
  0xdf   : > { %1273 = vrot.lane.b32.xlu1 %v1269_v27, %s1567_s20  ;;  %1301 = vst [vmem:[#allocation1] ss:$4 sm:$0xff] %v1537_v24  ;;  %1275 = vrot.lane.b32.xlu2 %v1271_v28, %s1567_s20 }
  0xe0   : > { %1485 = vmatmul.msk.bf16.vlgmr.msra.gmra.mxu0 %vm208_vm1, %v1484_v25 }
  0xe1   : > { %1493 = vmatmul.msk.bf16.vlgmr.msra.gmra.mxu2 %vm208_vm1, %v1492_v26  ;;  %v728_v30 = vpop.permute.xlu1 %727 }
  0xe2   : > { %v731_v31 = vsel %vm447_vm4, %v728_v30, %v730_v29 }
  0xe3   : > { %v736_v32 = vsel %vm212_vm0, %v731_v31, 0  ;;  %v1517_v31 = vld [vmem:[%s1929_s1 + $0x4] sm:$0xf] }
  0xe4   : > { %745 = vmatpush.bf16.msra.mxu1 %v736_v32  ;;  %v183_v32 = vlaneseq }
  0xe6   : > { %v1304_v35 = vld.sshfl [vmem:[#allocation1 + $0x8] sm:$0xff pattern:$0x73625140]  ;;  %v1302_v36 = vld.sshfl [vmem:[#allocation1] sm:$0xff pattern:$0x73625140] }
  0xe7   : > { %1240 = vrot.lane.b32.xlu1 %v1236_v19, %s1566_s19  ;;  %1308 = vrot.lane.b32.xlu0 %v1304_v35, %s1567_s20  ;;  %v1512_v19 = vld [vmem:[%s1929_s1 + $0x20] sm:$0xf]  ;;  %v184_v35 = vand.u32 127, %v183_v32 }
  0xe8   : > { %1488 = vmatmul.msk.bf16.vlgmr.msra.gmra.mxu1 %vm208_vm1, %v1487_v33  ;;  %1306 = vrot.lane.b32.xlu2 %v1302_v36, %s1567_s20 }
  0xe9   : > { %v816_v37 = vpop.permute.xlu0 %815  ;;  %1494 = vmatmul.msk.bf16.vlgmr.msra.gmra.mxu3 %vm208_vm1, %v764_v34  ;;  %v915_v47 = vpop.permute.xlu2 %914  ;;  %vm185_vm5 = vcmp.lt.s32.totalorder %v184_v35, 56 }
  0xea   : > { %v817_v39 = vsel %vm261_vm2, %v814_v38, %v816_v37  ;;  %v190_v37 = vand.u32 7, %v184_v35 }
  0xeb   : > { %v822_v40 = vsel %vm212_vm0, %v817_v39, 0 }
  0xec   : > { %831 = vmatpush.bf16.msrb.mxu0 %v822_v40  ;;  %vm198_vm6 = vcmp.lt.s32.totalorder %v190_v37, 7  ;;  %v1532_v37 = vld [vmem:[%s1929_s1 + $0x18] sm:$0xf] }
  0xed   : > { %vm199_vm7 = vmand %vm185_vm5, %vm198_vm6 }
  0xf0   : > { %1242 = vrot.lane.b32.xlu2 %v1238_v20, %s1566_s19  ;;  %1497 = vmatmul.msk.bf16.vlgmr.msrb.gmra.mxu0 %vm208_vm1, %v1496_v43 }
  0xf1   : > { %v849_v41 = vpop.permute.xlu1 %848  ;;  %v847_v42 = vpop.permute.xlu0 %846 }
  0xf2   : > { %v850_v44 = vsel %vm378_vm3, %v847_v42, %v849_v41  ;;  %v948_v56 = vpop.permute.xlu2 %947 }
  0xf3   : > { %v855_v45 = vsel %vm212_vm0, %v850_v44, 0  ;;  %v1521_v44 = vld [vmem:[%s1929_s1 + $0x8] sm:$0xf] }
  0xf4   : > { %864 = vmatpush.bf16.msrb.mxu1 %v855_v45 }
  0xf8   : > { %1499 = vmatmul.msk.bf16.vlgmr.msrb.gmra.mxu1 %vm208_vm1, %v1498_v46 }
  0xf9   : > { %v882_v48 = vpop.permute.xlu1 %881  ;;  %v880_v49 = vpop.permute.xlu0 %879 }
  0xfa   : > { %v883_v50 = vsel %vm378_vm3, %v880_v49, %v882_v48  ;;  %v979_v1 = vpop.permute.xlu2 %978 }
  0xfb   : > { %v888_v51 = vsel %vm212_vm0, %v883_v50, 0  ;;  %v1568_v50 = vmov 0.0  }
  0xfc   : > { %897 = vmatpush.bf16.msrb.mxu2 %v888_v51  ;;  %v1868_v51 = vsel %vm199_vm7, 1.0, %v1568_v50 }
  0xff   : > { %1502 = vmatmul.msk.bf16.vlgmr.msrb.gmra.mxu2 %vm208_vm1, %v1501_v52 }
 0x101   : > { %v913_v53 = vpop.permute.xlu1 %912 }
 0x102   : > { %v916_v54 = vsel %vm447_vm4, %v913_v53, %v915_v47  ;;  %v1012_v9 = vpop.permute.xlu2 %1011 }
 0x103   : > { %v921_v57 = vsel %vm212_vm0, %v916_v54, 0 }
 0x104   : > { %930 = vmatpush.bf16.msrb.mxu3 %v921_v57 }
 0x107   : > { %1504 = vmatmul.msk.bf16.vlgmr.msrb.gmra.mxu3 %vm208_vm1, %v1503_v58 }
 0x109   : > { %v946_v60 = vpop.permute.xlu1 %945 }
 0x10a   : > { %v949_v61 = vsel %vm378_vm3, %v946_v60, %v948_v56  ;;  %v1524_v56 = vld [vmem:[%s1929_s1 + $0xc] sm:$0xf] }
 0x10b   : > { %v954_v63 = vsel %vm212_vm0, %v949_v61, 0 }
 0x10c   : > { %963 = vmatpush.bf16.msra.mxu0 %v954_v63 }
 0x10f   : > { %1507 = vmatmul.msk.bf16.vlgmr.msra.gmra.mxu0 %vm208_vm1, %v1506_v0 }
 0x110   : > { %1094 = vmatpush.bf16.msrb.mxu0 %v1085_v15 }
 0x111   : > { %v981_v3 = vpop.permute.xlu0 %980 }
 0x112   : > { %v982_v5 = vsel %vm378_vm3, %v979_v1, %v981_v3  ;;  %v1109_v33 = vpop.permute.xlu2 %1108  ;;  %v1526_v1 = vld [vmem:[%s1929_s1 + $0x10] sm:$0xf] }
 0x113   : > { %v987_v6 = vsel %vm212_vm0, %v982_v5, 0 }
 0x114   : > { %996 = vmatpush.bf16.msra.mxu1 %v987_v6 }
 0x117   : > { %1510 = vmatmul.msk.bf16.vlgmr.msra.gmra.mxu1 %vm208_vm1, %v1509_v8 }
 0x119   : > { %v1014_v11 = vpop.permute.xlu0 %1013 }
 0x11a   : > { %v1015_v14 = vsel %vm447_vm4, %v1012_v9, %v1014_v11  ;;  %v1144_v47 = vpop.permute.xlu2 %1143  ;;  %v1529_v11 = vld [vmem:[%s1929_s1 + $0x14] sm:$0xf] }
 0x11b   : > { %v1020_v16 = vsel %vm212_vm0, %v1015_v14, 0  ;;  %v278_v17 = vpop.f32.mrf.mxu2  ;;  %v429_v27 = vpop.f32.mrf.mxu3 }
 0x11c   : > { %1029 = vmatpush.bf16.msra.mxu2 %v1020_v16  ;;  %v282_v20 = vadd.f32 %v278_v17, %v245_v10 }
 0x11d   : > { %v360_v21 = vpop.f32.mrf.mxu1 }
 0x11e   : > { %v306_v23 = vadd.f32 %v302_v4, %v282_v20 }
 0x11f   : > { %1513 = vmatmul.msk.bf16.vlgmr.msra.gmra.mxu2 %vm208_vm1, %v1512_v19  ;;  %1519 = vmatmul.msk.bf16.vlgmr.msrb.gmra.mxu0 %vm208_vm1, %v1048_v22 }
 0x120   : > { %v330_v30 = vadd.f32 %v326_v7, %v306_v23 }
 0x121   : > { %v1060_v24 = vpop.permute.xlu1 %1059  ;;  %v1058_v25 = vpop.permute.xlu0 %1057 }
 0x122   : > { %v1061_v26 = vsel %vm261_vm2, %v1058_v25, %v1060_v24  ;;  %v364_v36 = vadd.f32 %v360_v21, %v330_v30  ;;  %v1535_v25 = vld [vmem:[%s1929_s1 + $0x1c] sm:$0xf] }
 0x123   : > { %v1066_v28 = vsel %vm212_vm0, %v1061_v26, 0  ;;  %v280_v29 = vpop.f32.mrf.mxu2  ;;  %v431_v40 = vpop.f32.mrf.mxu3 }
 0x124   : > { %1075 = vmatpush.bf16.msra.mxu3 %v1066_v28 }
 0x125   : > { %v362_v34 = vpop.f32.mrf.mxu1 }
 0x127   : > { %1518 = vmatmul.msk.bf16.vlgmr.msra.gmra.mxu3 %vm208_vm1, %v1517_v31 }
 0x129   : > { %v1111_v38 = vpop.permute.xlu0 %1110 }
 0x12a   : > { %v1112_v39 = vsel %vm261_vm2, %v1109_v33, %v1111_v38  ;;  %v1538_v38 = vld [vmem:[%s1929_s1 + $0x20] sm:$0xf] }
 0x12b   : > { %v1117_v41 = vsel %vm212_vm0, %v1112_v39, 0  ;;  %v395_v42 = vpop.f32.mrf.mxu2 }
 0x12c   : > { %1126 = vmatpush.bf16.msrb.mxu1 %v1117_v41  ;;  %v399_v43 = vadd.f32 %v395_v42, %v364_v36 }
 0x12d   : > { %v464_v45 = vpop.f32.mrf.mxu0 }
 0x12e   : > { %v433_v46 = vadd.f32 %v429_v27, %v399_v43 }
 0x12f   : > { %1522 = vmatmul.msk.bf16.vlgmr.msrb.gmra.mxu1 %vm208_vm1, %v1521_v44 }
 0x130   : > { %v468_v48 = vadd.f32 %v464_v45, %v433_v46 }
 0x131   : > { %v1142_v49 = vpop.permute.xlu1 %1141 }
 0x132   : > { %v1145_v52 = vsel %vm378_vm3, %v1142_v49, %v1144_v47  ;;  %v469_v53 = vmul.f32 %v1868_v51, %v468_v48 }
 0x133   : > { %v1150_v54 = vsel %vm212_vm0, %v1145_v52, 0  ;;  %v397_v55 = vpop.f32.mrf.mxu2 }
 0x134   : > { %1159 = vmatpush.bf16.msrb.mxu2 %v1150_v54  ;;  %v470_v57 = vpack.c.bf16 %v469_v53, %v469_v53  ;;  %v509_v58 = vpop.f32.mrf.mxu1  ;;  %472 = vadd.xlane.f32.xlu0 %v469_v53  ;;  %v475_v19 = vmul.f32 %v469_v53, %v469_v53 }
 0x135   : > { %v466_v59 = vpop.f32.mrf.mxu0 }
 0x136   : > { %471 = vst [vmem:[%s1878_s11] sm:$0xf] %v470_v57  ;;  %476 = vadd.xlane.f32.xlu1 %v475_v19 }
 0x137   : > { %1525 = vmatmul.msk.bf16.vlgmr.msrb.gmra.mxu2 %vm208_vm1, %v1524_v56 }
 0x139   : > { %v1177_v60 = vpop.permute.xlu1 %1176  ;;  %v1175_v61 = vpop.permute.xlu0 %1174 }
 0x13a   : > { %v1178_v62 = vsel %vm447_vm4, %v1175_v61, %v1177_v60  ;;  %v1276_v8 = vpop.permute.xlu2 %1275 }
 0x13b   : > { %v1183_v63 = vsel %vm212_vm0, %v1178_v62, 0  ;;  %v528_v0 = vpop.f32.mrf.mxu2 }
 0x13c   : > { %1192 = vmatpush.bf16.msrb.mxu3 %v1183_v63  ;;  %v511_v2 = vpop.f32.mrf.mxu1  ;;  %v529_v14 = vadd.f32 %v528_v0, %v509_v58 }
 0x13d   : > { %v582_v3 = vpop.f32.mrf.mxu0 }
 0x13f   : > { %1527 = vmatmul.msk.bf16.vlgmr.msrb.gmra.mxu3 %vm208_vm1, %v1526_v1 }
 0x141   : > { %v1210_v4 = vpop.permute.xlu1 %1209  ;;  %v1208_v5 = vpop.permute.xlu0 %1207 }
 0x142   : > { %v1211_v6 = vsel %vm447_vm4, %v1208_v5, %v1210_v4  ;;  %v560_v7 = vpop.f32.mrf.mxu3  ;;  %v1307_v16 = vpop.permute.xlu2 %1306 }
 0x143   : > { %v1216_v9 = vsel %vm212_vm0, %v1211_v6, 0  ;;  %v530_v10 = vpop.f32.mrf.mxu2  ;;  %v564_v18 = vadd.f32 %v560_v7, %v529_v14 }
 0x144   : > { %1225 = vmatpush.bf16.msra.mxu0 %v1216_v9 }
 0x145   : > { %v615_v12 = vpop.f32.mrf.mxu1  ;;  %v584_v13 = vpop.f32.mrf.mxu0  ;;  %v586_v22 = vadd.f32 %v582_v3, %v564_v18 }
 0x147   : > { %1530 = vmatmul.msk.bf16.vlgmr.msra.gmra.mxu0 %vm208_vm1, %v1529_v11  ;;  %v619_v26 = vadd.f32 %v615_v12, %v586_v22 }
 0x14a   : > { %v562_v15 = vpop.f32.mrf.mxu3  ;;  %v1243_v27 = vpop.permute.xlu2 %1242 }
 0x14d   : > { %v617_v17 = vpop.f32.mrf.mxu1 }
 0x151   : > { %v1274_v20 = vpop.permute.xlu1 %1273 }
 0x152   : > { %v1277_v21 = vsel %vm447_vm4, %v1274_v20, %v1276_v8 }
 0x153   : > { %v1282_v23 = vsel %vm212_vm0, %v1277_v21, 0 }
 0x154   : > { %v648_v24 = vpop.f32.mrf.mxu2  ;;  %1291 = vmatpush.bf16.msra.mxu2 %v1282_v23 }
 0x155   : > { %v652_v32 = vadd.f32 %v648_v24, %v619_v26 }
 0x157   : > { %1536 = vmatmul.msk.bf16.vlgmr.msra.gmra.mxu2 %vm208_vm1, %v1535_v25 }
 0x159   : > { %v1241_v28 = vpop.permute.xlu1 %1240  ;;  %v1309_v29 = vpop.permute.xlu0 %1308 }
 0x15a   : > { %v1310_v30 = vsel %vm447_vm4, %v1307_v16, %v1309_v29  ;;  %v1244_v31 = vsel %vm378_vm3, %v1241_v28, %v1243_v27  ;;  %v681_v33 = vpop.f32.mrf.mxu3 }
 0x15b   : > { %v1315_v34 = vsel %vm212_vm0, %v1310_v30, 0  ;;  %v1249_v35 = vsel %vm212_vm0, %v1244_v31, 0  ;;  %v685_v40 = vadd.f32 %v681_v33, %v652_v32 }
 0x15c   : > { %v650_v36 = vpop.f32.mrf.mxu2  ;;  %1258 = vmatpush.bf16.msra.mxu1 %v1249_v35  ;;  %1324 = vmatpush.bf16.msra.mxu3 %v1315_v34 }
 0x15d   : > { %v714_v39 = vpop.f32.mrf.mxu0 }
 0x15e   : > { %v718_v41 = vadd.f32 %v714_v39, %v685_v40 }
 0x15f   : > { %1533 = vmatmul.msk.bf16.vlgmr.msra.gmra.mxu1 %vm208_vm1, %v1532_v37  ;;  %1539 = vmatmul.msk.bf16.vlgmr.msra.gmra.mxu3 %vm208_vm1, %v1538_v38 }
 0x162   : > { %v683_v42 = vpop.f32.mrf.mxu3 }
 0x164   : > { %v782_v43 = vpop.f32.mrf.mxu2 }
 0x165   : > { %v747_v44 = vpop.f32.mrf.mxu1  ;;  %v716_v45 = vpop.f32.mrf.mxu0 }
 0x166   : > { %v751_v46 = vadd.f32 %v747_v44, %v718_v41 }
 0x168   : > { %v752_v47 = vmul.f32 %v1868_v51, %v751_v46 }
 0x16a   : > { %v753_v48 = vpack.c.bf16 %v752_v47, %v752_v47  ;;  %756 = vadd.xlane.f32.xlu2 %v752_v47  ;;  %v759_v53 = vmul.f32 %v752_v47, %v752_v47 }
 0x16c   : > { %v784_v49 = vpop.f32.mrf.mxu2  ;;  %1489 = vst [vmem:[%s1878_s11 + $0x4] sm:$0xf] %v753_v48  ;;  %v801_v50 = vpop.f32.mrf.mxu3 }
 0x16d   : > { %v749_v52 = vpop.f32.mrf.mxu1  ;;  %v833_v54 = vpop.f32.mrf.mxu0  ;;  %v802_v60 = vadd.f32 %v801_v50, %v782_v43 }
 0x16f   : > { %v837_v63 = vadd.f32 %v833_v54, %v802_v60 }
 0x172   : > { %760 = vadd.xlane.f32.xlu2 %v759_v53 }
 0x174   : > { %v803_v55 = vpop.f32.mrf.mxu3 }
 0x175   : > { %v866_v56 = vpop.f32.mrf.mxu1  ;;  %v835_v57 = vpop.f32.mrf.mxu0 }
 0x176   : > { %v870_v1 = vadd.f32 %v866_v56, %v837_v63 }
 0x17d   : > { %v868_v58 = vpop.f32.mrf.mxu1 }
 0x182   : > { %v899_v59 = vpop.f32.mrf.mxu2 }
 0x183   : > { %v903_v3 = vadd.f32 %v899_v59, %v870_v1 }
 0x18a   : > { %v901_v61 = vpop.f32.mrf.mxu2  ;;  %v932_v62 = vpop.f32.mrf.mxu3 }
 0x18b   : > { %v936_v6 = vadd.f32 %v932_v62, %v903_v3 }
 0x18c   : > { %v965_v0 = vpop.f32.mrf.mxu0 }
 0x18d   : > { %v969_v7 = vadd.f32 %v965_v0, %v936_v6 }
 0x192   : > { %v934_v2 = vpop.f32.mrf.mxu3 }
 0x194   : > { %v998_v4 = vpop.f32.mrf.mxu1  ;;  %v967_v5 = vpop.f32.mrf.mxu0 }
 0x195   : > { %v1002_v10 = vadd.f32 %v998_v4, %v969_v7 }
 0x19c   : > { %v1000_v8 = vpop.f32.mrf.mxu1  ;;  %v1096_v9 = vpop.f32.mrf.mxu0 }
 0x1a2   : > { %v1031_v11 = vpop.f32.mrf.mxu2 }
 0x1a3   : > { %v1035_v12 = vadd.f32 %v1031_v11, %v1002_v10 }
 0x1a4   : > { %v1098_v13 = vpop.f32.mrf.mxu0 }
 0x1a5   : > { %v1036_v14 = vmul.f32 %v1868_v51, %v1035_v12 }
 0x1a7   : > { %v1037_v15 = vpack.c.bf16 %v1036_v14, %v1036_v14  ;;  %1040 = vadd.xlane.f32.xlu0 %v1036_v14  ;;  %v1043_v16 = vmul.f32 %v1036_v14, %v1036_v14  ;;  %v473_v46 = vpop.xlane.xlu0 %472 }
 0x1a9   : > { %1514 = vst [vmem:[%s1878_s11 + $0x8] sm:$0xf] %v1037_v15  ;;  %1044 = vadd.xlane.f32.xlu1 %v1043_v16  ;;  %v477_v47 = vpop.xlane.xlu1 %476 }
 0x1aa   : > { %v1077_v17 = vpop.f32.mrf.mxu3  ;;  %v1033_v18 = vpop.f32.mrf.mxu2 }
 0x1ab   : > { %v1097_v27 = vadd.f32 %v1096_v9, %v1077_v17 }
 0x1ac   : > { %v1128_v19 = vpop.f32.mrf.mxu1 }
 0x1ad   : > { %v1132_v29 = vadd.f32 %v1128_v19, %v1097_v27 }
 0x1b2   : > { %v1079_v20 = vpop.f32.mrf.mxu3 }
 0x1b4   : > { %v1130_v21 = vpop.f32.mrf.mxu1 }
 0x1ba   : > { %v1161_v22 = vpop.f32.mrf.mxu2 }
 0x1bb   : > { %v1165_v30 = vadd.f32 %v1161_v22, %v1132_v29 }
 0x1c2   : > { %v1194_v23 = vpop.f32.mrf.mxu3  ;;  %v1163_v24 = vpop.f32.mrf.mxu2 }
 0x1c3   : > { %v1198_v31 = vadd.f32 %v1194_v23, %v1165_v30 }
 0x1c4   : > { %v1227_v25 = vpop.f32.mrf.mxu0 }
 0x1c5   : > { %v1231_v33 = vadd.f32 %v1227_v25, %v1198_v31 }
 0x1ca   : > { %v1196_v26 = vpop.f32.mrf.mxu3 }
 0x1cc   : > { %v1229_v28 = vpop.f32.mrf.mxu0 }
 0x1da   : > { %v1293_v32 = vpop.f32.mrf.mxu2 }
 0x1dc   : > { %v1260_v34 = vpop.f32.mrf.mxu1 }
 0x1dd   : > { %v1264_v35 = vadd.f32 %v1260_v34, %v1231_v33  ;;  %v757_v45 = vpop.xlane.xlu2 %756 }
 0x1de   : > { %v758_v50 = vadd.f32 %v757_v45, %v473_v46 }
 0x1df   : > { %v1297_v36 = vadd.f32 %v1293_v32, %v1264_v35 }
 0x1e2   : > { %v1326_v37 = vpop.f32.mrf.mxu3  ;;  %v1295_v38 = vpop.f32.mrf.mxu2 }
 0x1e3   : > { %v1330_v39 = vadd.f32 %v1326_v37, %v1297_v36 }
 0x1e4   : > { %v1262_v40 = vpop.f32.mrf.mxu1 }
 0x1e5   : > { %v1331_v41 = vmul.f32 %v1868_v51, %v1330_v39  ;;  %v761_v48 = vpop.xlane.xlu2 %760 }
 0x1e6   : > { %v762_v53 = vadd.f32 %v761_v48, %v477_v47 }
 0x1e7   : > { %v1332_v42 = vpack.c.bf16 %v1331_v41, %v1331_v41  ;;  %1335 = vadd.xlane.f32.xlu2 %v1331_v41  ;;  %v1338_v43 = vmul.f32 %v1331_v41, %v1331_v41 }
 0x1e9   : > { %1540 = vst [vmem:[%s1878_s11 + $0xc] sm:$0xf] %v1332_v42  ;;  %1339 = vadd.xlane.f32.xlu0 %v1338_v43 }
 0x1ea   : > { %v1328_v44 = vpop.f32.mrf.mxu3 }
 0x21a   : > { %v1041_v49 = vpop.xlane.xlu0 %1040 }
 0x21b   : > { %v1042_v54 = vadd.f32 %v1041_v49, %v758_v50 }
 0x21c   : > { %v1045_v52 = vpop.xlane.xlu1 %1044 }
 0x21d   : > { %v1046_v55 = vadd.f32 %v1045_v52, %v762_v53 }
 0x25a   : > { %v1336_v51 = vpop.xlane.xlu2 %1335 }
 0x25b   : > { %v1337_v56 = vadd.f32 %v1336_v51, %v1042_v54 }
 0x25c   : > { %v1340_v57 = vpop.xlane.xlu0 %1339 }
 0x25d   : > { %1343 = vst.msk [vmem:[%s181_s30] sm:$0xff] %vm1342_vm8, %v1337_v56  ;;  %v1341_v58 = vadd.f32 %v1340_v57, %v1046_v55 }
 0x25f   : > { %1345 = vst.msk [vmem:[%s181_s30] sm:$0xff] %vm1344_vm9, %v1341_v58 }
 0x260 PF: > { %s14_s12 = sadd.s32 1, %s1563_s12  }
 0x261   : > { %p11_p4 = scmp.ge.s32.totalorder %s14_s12, 4  }
 0x263   :  { %13 = sbr.rel (!%p11_p4) target bundleno = 1 (0x1), region = 84 }

</bundles_post_ra>
